<compile_context>
chip_gen: v5e
topology: v5e:2x2
jax: 0.10.0
libtpu: 0.0.40
codegen_flags: <defaults>
</compile_context>

<pallas_src>
import jax
import jax.numpy as jnp
from jax import lax
from jax.experimental import pallas as pl
from jax.experimental.pallas import tpu as pltpu

LANE = 128


def _round_up(x, m):
    return ((x + m - 1) // m) * m


def _row_tile(n):
    for t in (256, 128, 64, 32, 16, 8):
        if n % t == 0:
            return t
    return n


# ----------------------------- Pallas kernels ------------------------------ #

def _layer1_proj_kernel(a_ref, g1_ref, b1_ref, w2_ref, xw_ref, acc_ref):
    """acc += A_r @ G1_r ; epilogue: x = relu(acc + b1); xw = x @ W2cat."""
    r = pl.program_id(1)

    @pl.when(r == 0)
    def _():
        acc_ref[...] = jnp.zeros_like(acc_ref)

    acc_ref[...] += jnp.dot(a_ref[0], g1_ref[...],
                            preferred_element_type=jnp.float32)

    @pl.when(r == pl.num_programs(1) - 1)
    def _():
        # bias + ReLU stay in f32 (v5e has no bf16 VPU); only dot inputs are bf16
        x = jnp.maximum(acc_ref[...] + b1_ref[...], 0.0)
        xw_ref[...] = jnp.dot(x.astype(jnp.bfloat16), w2_ref[...],
                              preferred_element_type=jnp.float32
                              ).astype(xw_ref.dtype)


def _layer2_kernel(a_ref, xw_ref, b2_ref, o_ref):
    """o += A_r @ XW_r (accumulate directly in the resident f32 output block)."""
    r = pl.program_id(1)

    @pl.when(r == 0)
    def _():
        o_ref[...] = jnp.zeros_like(o_ref)

    o_ref[...] += jnp.dot(a_ref[0], xw_ref[...],
                          preferred_element_type=jnp.float32)

    @pl.when(r == pl.num_programs(1) - 1)
    def _():
        o_ref[...] += b2_ref[...]


# ------------------------------- wrappers ---------------------------------- #

def _layer1_call(a3_bf, g1, b1_pad, w2cat, tm):
    R, N, _ = a3_bf.shape
    Ep = b1_pad.shape[1]
    RCp = w2cat.shape[1]
    return pl.pallas_call(
        _layer1_proj_kernel,
        out_shape=jax.ShapeDtypeStruct((N, RCp), jnp.bfloat16),
        grid_spec=pltpu.PrefetchScalarGridSpec(
            num_scalar_prefetch=0,
            grid=(N // tm, R),
            in_specs=[
                pl.BlockSpec((1, tm, N), lambda i, r: (r, i, 0)),    # A3[r], row tile
                pl.BlockSpec((N, Ep), lambda i, r: (0, r)),          # G1 relation slice
                pl.BlockSpec((1, Ep), lambda i, r: (0, 0)),          # bias1 (resident)
                pl.BlockSpec((Ep, RCp), lambda i, r: (0, 0)),        # W2cat (resident)
            ],
            out_specs=pl.BlockSpec((tm, RCp), lambda i, r: (i, 0)),  # lane-dense slab
            scratch_shapes=[pltpu.VMEM((tm, Ep), jnp.float32)],
        ),
        compiler_params=pltpu.CompilerParams(
            dimension_semantics=("parallel", "arbitrary")),
    )(a3_bf, g1, b1_pad, w2cat)


def _layer2_call(a3_bf, xw, b2_pad, tm):
    R, N, _ = a3_bf.shape
    Cp = b2_pad.shape[1]
    return pl.pallas_call(
        _layer2_kernel,
        out_shape=jax.ShapeDtypeStruct((N, Cp), jnp.float32),
        grid_spec=pltpu.PrefetchScalarGridSpec(
            num_scalar_prefetch=0,
            grid=(N // tm, R),
            in_specs=[
                pl.BlockSpec((1, tm, N), lambda i, r: (r, i, 0)),    # A3[r], row tile
                pl.BlockSpec((N, Cp), lambda i, r: (0, r)),          # XW relation slice
                pl.BlockSpec((1, Cp), lambda i, r: (0, 0)),          # bias2 (resident)
            ],
            out_specs=pl.BlockSpec((tm, Cp), lambda i, r: (i, 0)),
        ),
        compiler_params=pltpu.CompilerParams(
            dimension_semantics=("parallel", "arbitrary")),
    )(a3_bf, xw, b2_pad)


@jax.jit
def forward(a3, node_embeddings, w1, b1, w2, b2):
    R, N, _ = a3.shape
    E = node_embeddings.shape[1]
    C = w2.shape[2]
    Ep = _round_up(E, LANE)
    Cp = _round_up(C, LANE)
    tm = _row_tile(N)

    # bf16 HBM streams for the MXU; padding keeps outputs lane-dense.
    a3_bf = a3.astype(jnp.bfloat16)

    f_pad = jnp.pad(node_embeddings, ((0, 0), (0, Ep - E)))
    w1_pad = jnp.pad(w1, ((0, 0), (0, Ep - E)))
    # G1[j, r*Ep + e] = F[j, e] * w1[r, e]   (stacked operand of layer 1)
    g1 = (f_pad[:, None, :] * w1_pad[None, :, :]).reshape(N, R * Ep)
    g1 = g1.astype(jnp.bfloat16)
    b1_pad = jnp.pad(b1, (0, Ep - E)).reshape(1, Ep).astype(jnp.float32)

    # W2cat[e, r*Cp + c] = w2[r, e, c]   (all relations' projections side by side)
    w2_pad = jnp.pad(w2, ((0, 0), (0, Ep - E), (0, Cp - C)))
    w2cat = jnp.transpose(w2_pad, (1, 0, 2)).reshape(Ep, R * Cp).astype(jnp.bfloat16)
    b2_pad = jnp.pad(b2, (0, Cp - C)).reshape(1, Cp).astype(jnp.float32)

    xw = _layer1_call(a3_bf, g1, b1_pad, w2cat, tm)   # (N, R*Cp) bf16 = [X @ W_r]_r
    out = _layer2_call(a3_bf, xw, b2_pad, tm)         # (N, Cp) f32
    return out[:, :C]


# ------------------------ graph / adjacency setup --------------------------- #
# Replicates add_inverse_and_self + stack_matrices (horizontal) + sum_sparse
# (column normalization with the "transpose trick" reorder) as a dense matrix.

def build_adjacency(triples, nnodes, nrel):
    T = triples.shape[0]
    R = 2 * nrel + 1
    inv = jnp.stack([triples[:, 2], triples[:, 1] + nrel, triples[:, 0]], axis=1)
    self_idx = jnp.arange(nnodes, dtype=triples.dtype)
    self_loops = jnp.stack(
        [self_idx, jnp.full((nnodes,), 2 * nrel, dtype=triples.dtype), self_idx], axis=1)
    tp = jnp.concatenate([triples, inv, self_loops], axis=0)   # (2T + N, 3)

    fr = tp[:, 0]
    to = tp[:, 1] * nnodes + tp[:, 2]                          # horizontal stacking

    # column-wise sums (with multiplicity), then re-shuffle fwd/inv blocks
    col_counts = jnp.zeros((R * nnodes,), jnp.float32).at[to].add(1.0)
    sums = col_counts[to]
    sums = jnp.concatenate([sums[T:2 * T], sums[:T], sums[-nnodes:]], axis=0)
    vals = 1.0 / sums

    A = jnp.zeros((nnodes, R * nnodes), jnp.float32).at[fr, to].add(vals)
    # A3[r, i, j] = A[i, r*N + j]
    return A.reshape(nnodes, R, nnodes).transpose(1, 0, 2)


# ----------------------------------- main ----------------------------------- #

if __name__ == "__main__":
    nnodes, nrel, nemb, nclass, ntriples = 64, 4, 32, 8, 200
    R = 2 * nrel + 1

    key = jax.random.PRNGKey(0)
    k_s, k_p, k_o, k_emb, k_w1, k_w2 = jax.random.split(key, 6)

    # synthetic knowledge-graph triples (subject, predicate, object)
    subj = jax.random.randint(k_s, (ntriples,), 0, nnodes)
    pred = jax.random.randint(k_p, (ntriples,), 0, nrel)
    obj = jax.random.randint(k_o, (ntriples,), 0, nnodes)
    triples = jnp.stack([subj, pred, obj], axis=1)

    # parameters (deterministic synthetic init, shapes per module __init__)
    node_embeddings = (jax.random.normal(k_emb, (nnodes, nemb), jnp.float32)
                       * jnp.sqrt(2.0 / nemb))                       # kaiming_normal fan_in
    bound1 = jnp.sqrt(2.0) * jnp.sqrt(6.0 / (nemb + R))
    w1 = jax.random.uniform(k_w1, (R, nemb), jnp.float32, -bound1, bound1)   # no_hidden diag weights
    b1 = jnp.zeros((nemb,), jnp.float32)
    bound2 = jnp.sqrt(2.0) * jnp.sqrt(6.0 / (nemb * nclass + R * nclass))
    w2 = jax.random.uniform(k_w2, (R, nemb, nclass), jnp.float32, -bound2, bound2)
    b2 = jnp.zeros((nclass,), jnp.float32)

    a3 = build_adjacency(triples, nnodes, nrel)

    out = forward(a3, node_embeddings, w1, b1, w2, b2)
    out = jax.block_until_ready(out)

    # pure-JAX f32 reference for sanity
    ref1 = jnp.einsum('rij,je,re->ie', a3, node_embeddings, w1,
                      precision=lax.Precision.HIGHEST) + b1
    ref1 = jnp.maximum(ref1, 0.0)
    ref2 = jnp.einsum('rij,je,rec->ic', a3, ref1, w2,
                      precision=lax.Precision.HIGHEST) + b2

    assert out.shape == (nnodes, nclass)
    assert jnp.allclose(out, ref2, rtol=2e-2, atol=2e-2)
    print("KERNEL_OK")
</pallas_src>

<mosaic_0001>
module attributes {stable_mosaic.version = 11 : i64} {
  func.func @_layer2_kernel(%arg0: i32, %arg1: i32, %arg2: memref<1x64x64xbf16, #tpu.memory_space<vmem>>, %arg3: memref<64x128xbf16, #tpu.memory_space<vmem>>, %arg4: memref<1x128xf32, #tpu.memory_space<vmem>>, %arg5: memref<64x128xf32, #tpu.memory_space<vmem>>) attributes {dimension_semantics = [#tpu.dimension_semantics<parallel>, #tpu.dimension_semantics<arbitrary>], iteration_bounds = array<i64: 1, 9>, scalar_prefetch = 0 : i64, scratch_operands = 0 : i64, tpu.core_type = #tpu.core_type<tc>, window_params = [{transform_indices = @transform_0, window_bounds = array<i64: 1, 64, 64>}, {transform_indices = @transform_1, window_bounds = array<i64: 64, 128>}, {pipeline_mode = #tpu.pipeline_mode<synchronous>, transform_indices = @transform_2, window_bounds = array<i64: 1, 128>}, {transform_indices = @transform_3, window_bounds = array<i64: 64, 128>}]} {
    %c0_i32 = arith.constant 0 : i32
    %0 = arith.cmpi eq, %arg1, %c0_i32 : i32
    %1 = arith.extui %0 : i1 to i32
    %c0_i32_0 = arith.constant 0 : i32
    %2 = arith.cmpi ne, %1, %c0_i32_0 : i32
    scf.if %2 {
      %cst_10 = arith.constant 0.000000e+00 : f32
      %13 = vector.broadcast %cst_10 : f32 to vector<64x128xf32>
      %c0_11 = arith.constant 0 : index
      %c0_12 = arith.constant 0 : index
      %14 = vector.load %arg5[%c0_11, %c0_12] : memref<64x128xf32, #tpu.memory_space<vmem>>, vector<64x128xf32>
      tpu.vector_store %arg5[%c0_11, %c0_12], %13 {strides = array<i32>} : memref<64x128xf32, #tpu.memory_space<vmem>>, vector<64x128xf32>,
    } else {
    }
    %c0 = arith.constant 0 : index
    %c0_1 = arith.constant 0 : index
    %3 = vector.load %arg5[%c0, %c0_1] : memref<64x128xf32, #tpu.memory_space<vmem>>, vector<64x128xf32>
    %c0_2 = arith.constant 0 : index
    %c0_3 = arith.constant 0 : index
    %c0_4 = arith.constant 0 : index
    %4 = vector.load %arg2[%c0_2, %c0_3, %c0_4] : memref<1x64x64xbf16, #tpu.memory_space<vmem>>, vector<1x64x64xbf16>
    %5 = vector.shape_cast %4 : vector<1x64x64xbf16> to vector<64x64xbf16>
    %c0_5 = arith.constant 0 : index
    %c0_6 = arith.constant 0 : index
    %6 = vector.load %arg3[%c0_5, %c0_6] : memref<64x128xbf16, #tpu.memory_space<vmem>>, vector<64x128xbf16>
    %cst = arith.constant dense<0.000000e+00> : vector<64x128xf32>
    %7 = tpu.matmul %5, %6, %cst {dimension_numbers = #tpu.dot_dimension_numbers<[1], [0], [0], [1], [0, 0, 1, 1], [], []>} : vector<64x64xbf16>, vector<64x128xbf16>, vector<64x128xf32> -> vector<64x128xf32>
    %8 = arith.addf %3, %7 : vector<64x128xf32>
    %c0_7 = arith.constant 0 : index
    %c0_8 = arith.constant 0 : index
    %9 = vector.load %arg5[%c0_7, %c0_8] : memref<64x128xf32, #tpu.memory_space<vmem>>, vector<64x128xf32>
    tpu.vector_store %arg5[%c0_7, %c0_8], %8 {strides = array<i32>} : memref<64x128xf32, #tpu.memory_space<vmem>>, vector<64x128xf32>,
    %c8_i32 = arith.constant 8 : i32
    %10 = arith.cmpi eq, %arg1, %c8_i32 : i32
    %11 = arith.extui %10 : i1 to i32
    %c0_i32_9 = arith.constant 0 : i32
    %12 = arith.cmpi ne, %11, %c0_i32_9 : i32
    scf.if %12 {
      %c0_10 = arith.constant 0 : index
      %c0_11 = arith.constant 0 : index
      %13 = vector.load %arg5[%c0_10, %c0_11] : memref<64x128xf32, #tpu.memory_space<vmem>>, vector<64x128xf32>
      %c0_12 = arith.constant 0 : index
      %c0_13 = arith.constant 0 : index
      %14 = vector.load %arg4[%c0_12, %c0_13] : memref<1x128xf32, #tpu.memory_space<vmem>>, vector<1x128xf32>
      %15 = vector.broadcast %14 : vector<1x128xf32> to vector<64x128xf32>
      %16 = arith.addf %13, %15 : vector<64x128xf32>
      %c0_14 = arith.constant 0 : index
      %c0_15 = arith.constant 0 : index
      %17 = vector.load %arg5[%c0_14, %c0_15] : memref<64x128xf32, #tpu.memory_space<vmem>>, vector<64x128xf32>
      tpu.vector_store %arg5[%c0_14, %c0_15], %16 {strides = array<i32>} : memref<64x128xf32, #tpu.memory_space<vmem>>, vector<64x128xf32>,
    } else {
    }
    return
  }
  func.func @transform_0(%arg0: i32, %arg1: i32) -> (i32, i32, i32) {
    %c0_i32 = arith.constant 0 : i32
    %c0_i32_0 = arith.constant 0 : i32
    return %arg1, %arg0, %c0_i32 : i32, i32, i32
  }
  func.func @transform_1(%arg0: i32, %arg1: i32) -> (i32, i32) {
    %c0_i32 = arith.constant 0 : i32
    %c0_i32_0 = arith.constant 0 : i32
    return %c0_i32, %arg1 : i32, i32
  }
  func.func @transform_2(%arg0: i32, %arg1: i32) -> (i32, i32) {
    %c0_i32 = arith.constant 0 : i32
    %c0_i32_0 = arith.constant 0 : i32
    %c0_i32_1 = arith.constant 0 : i32
    return %c0_i32, %c0_i32_0 : i32, i32
  }
  func.func @transform_3(%arg0: i32, %arg1: i32) -> (i32, i32) {
    %c0_i32 = arith.constant 0 : i32
    %c0_i32_0 = arith.constant 0 : i32
    return %arg0, %c0_i32 : i32, i32
  }
}

module attributes {stable_mosaic.version = 11 : i64} {
  func.func @_layer1_proj_kernel(%arg0: i32, %arg1: i32, %arg2: memref<1x64x64xbf16, #tpu.memory_space<vmem>>, %arg3: memref<64x128xbf16, #tpu.memory_space<vmem>>, %arg4: memref<1x128xf32, #tpu.memory_space<vmem>>, %arg5: memref<128x1152xbf16, #tpu.memory_space<vmem>>, %arg6: memref<64x1152xbf16, #tpu.memory_space<vmem>>, %arg7: memref<64x128xf32, #tpu.memory_space<vmem>>) attributes {dimension_semantics = [#tpu.dimension_semantics<parallel>, #tpu.dimension_semantics<arbitrary>], iteration_bounds = array<i64: 1, 9>, scalar_prefetch = 0 : i64, scratch_operands = 1 : i64, tpu.core_type = #tpu.core_type<tc>, window_params = [{transform_indices = @transform_0, window_bounds = array<i64: 1, 64, 64>}, {transform_indices = @transform_1, window_bounds = array<i64: 64, 128>}, {pipeline_mode = #tpu.pipeline_mode<synchronous>, transform_indices = @transform_2, window_bounds = array<i64: 1, 128>}, {pipeline_mode = #tpu.pipeline_mode<synchronous>, transform_indices = @transform_3, window_bounds = array<i64: 128, 1152>}, {transform_indices = @transform_4, window_bounds = array<i64: 64, 1152>}]} {
    %c0_i32 = arith.constant 0 : i32
    %0 = arith.cmpi eq, %arg1, %c0_i32 : i32
    %1 = arith.extui %0 : i1 to i32
    %c0_i32_0 = arith.constant 0 : i32
    %2 = arith.cmpi ne, %1, %c0_i32_0 : i32
    scf.if %2 {
      %cst_10 = arith.constant 0.000000e+00 : f32
      %13 = vector.broadcast %cst_10 : f32 to vector<64x128xf32>
      %c0_11 = arith.constant 0 : index
      %c0_12 = arith.constant 0 : index
      %14 = vector.load %arg7[%c0_11, %c0_12] : memref<64x128xf32, #tpu.memory_space<vmem>>, vector<64x128xf32>
      tpu.vector_store %arg7[%c0_11, %c0_12], %13 {strides = array<i32>} : memref<64x128xf32, #tpu.memory_space<vmem>>, vector<64x128xf32>,
    } else {
    }
    %c0 = arith.constant 0 : index
    %c0_1 = arith.constant 0 : index
    %3 = vector.load %arg7[%c0, %c0_1] : memref<64x128xf32, #tpu.memory_space<vmem>>, vector<64x128xf32>
    %c0_2 = arith.constant 0 : index
    %c0_3 = arith.constant 0 : index
    %c0_4 = arith.constant 0 : index
    %4 = vector.load %arg2[%c0_2, %c0_3, %c0_4] : memref<1x64x64xbf16, #tpu.memory_space<vmem>>, vector<1x64x64xbf16>
    %5 = vector.shape_cast %4 : vector<1x64x64xbf16> to vector<64x64xbf16>
    %c0_5 = arith.constant 0 : index
    %c0_6 = arith.constant 0 : index
    %6 = vector.load %arg3[%c0_5, %c0_6] : memref<64x128xbf16, #tpu.memory_space<vmem>>, vector<64x128xbf16>
    %cst = arith.constant dense<0.000000e+00> : vector<64x128xf32>
    %7 = tpu.matmul %5, %6, %cst {dimension_numbers = #tpu.dot_dimension_numbers<[1], [0], [0], [1], [0, 0, 1, 1], [], []>} : vector<64x64xbf16>, vector<64x128xbf16>, vector<64x128xf32> -> vector<64x128xf32>
    %8 = arith.addf %3, %7 : vector<64x128xf32>
    %c0_7 = arith.constant 0 : index
    %c0_8 = arith.constant 0 : index
    %9 = vector.load %arg7[%c0_7, %c0_8] : memref<64x128xf32, #tpu.memory_space<vmem>>, vector<64x128xf32>
    tpu.vector_store %arg7[%c0_7, %c0_8], %8 {strides = array<i32>} : memref<64x128xf32, #tpu.memory_space<vmem>>, vector<64x128xf32>,
    %c8_i32 = arith.constant 8 : i32
    %10 = arith.cmpi eq, %arg1, %c8_i32 : i32
    %11 = arith.extui %10 : i1 to i32
    %c0_i32_9 = arith.constant 0 : i32
    %12 = arith.cmpi ne, %11, %c0_i32_9 : i32
    scf.if %12 {
      %c0_10 = arith.constant 0 : index
      %c0_11 = arith.constant 0 : index
      %13 = vector.load %arg7[%c0_10, %c0_11] : memref<64x128xf32, #tpu.memory_space<vmem>>, vector<64x128xf32>
      %c0_12 = arith.constant 0 : index
      %c0_13 = arith.constant 0 : index
      %14 = vector.load %arg4[%c0_12, %c0_13] : memref<1x128xf32, #tpu.memory_space<vmem>>, vector<1x128xf32>
      %15 = vector.broadcast %14 : vector<1x128xf32> to vector<64x128xf32>
      %16 = arith.addf %13, %15 : vector<64x128xf32>
      %cst_14 = arith.constant 0.000000e+00 : f32
      %17 = vector.broadcast %cst_14 : f32 to vector<64x128xf32>
      %18 = arith.maximumf %16, %17 : vector<64x128xf32>
      %19 = arith.truncf %18 : vector<64x128xf32> to vector<64x128xbf16>
      %c0_15 = arith.constant 0 : index
      %c0_16 = arith.constant 0 : index
      %20 = vector.load %arg5[%c0_15, %c0_16] : memref<128x1152xbf16, #tpu.memory_space<vmem>>, vector<128x1152xbf16>
      %cst_17 = arith.constant dense<0.000000e+00> : vector<64x1152xf32>
      %21 = tpu.matmul %19, %20, %cst_17 {dimension_numbers = #tpu.dot_dimension_numbers<[1], [0], [0], [1], [0, 0, 1, 1], [], []>} : vector<64x128xbf16>, vector<128x1152xbf16>, vector<64x1152xf32> -> vector<64x1152xf32>
      %22 = arith.truncf %21 : vector<64x1152xf32> to vector<64x1152xbf16>
      %c0_18 = arith.constant 0 : index
      %c0_19 = arith.constant 0 : index
      %23 = vector.load %arg6[%c0_18, %c0_19] : memref<64x1152xbf16, #tpu.memory_space<vmem>>, vector<64x1152xbf16>
      tpu.vector_store %arg6[%c0_18, %c0_19], %22 {strides = array<i32>} : memref<64x1152xbf16, #tpu.memory_space<vmem>>, vector<64x1152xbf16>,
    } else {
    }
    return
  }
  func.func @transform_0(%arg0: i32, %arg1: i32) -> (i32, i32, i32) {
    %c0_i32 = arith.constant 0 : i32
    %c0_i32_0 = arith.constant 0 : i32
    return %arg1, %arg0, %c0_i32 : i32, i32, i32
  }
  func.func @transform_1(%arg0: i32, %arg1: i32) -> (i32, i32) {
    %c0_i32 = arith.constant 0 : i32
    %c0_i32_0 = arith.constant 0 : i32
    return %c0_i32, %arg1 : i32, i32
  }
  func.func @transform_2(%arg0: i32, %arg1: i32) -> (i32, i32) {
    %c0_i32 = arith.constant 0 : i32
    %c0_i32_0 = arith.constant 0 : i32
    %c0_i32_1 = arith.constant 0 : i32
    return %c0_i32, %c0_i32_0 : i32, i32
  }
  func.func @transform_3(%arg0: i32, %arg1: i32) -> (i32, i32) {
    %c0_i32 = arith.constant 0 : i32
    %c0_i32_0 = arith.constant 0 : i32
    %c0_i32_1 = arith.constant 0 : i32
    return %c0_i32, %c0_i32_0 : i32, i32
  }
  func.func @transform_4(%arg0: i32, %arg1: i32) -> (i32, i32) {
    %c0_i32 = arith.constant 0 : i32
    %c0_i32_0 = arith.constant 0 : i32
    return %arg0, %c0_i32 : i32, i32
  }
}

</mosaic_0001>

<bundles_post_ra>
// kernel: forward.3
= control target key start
LH: loop header
LB: loop body
LE: loop exit
PB: predicated region body
PF: predicated region fallthrough
CT: control target
= control target key end

     0   :  { %s723_s12 = smov 0   ;;  %s725_s13 = smov 0   ;;  %s920_s0 = inlined_call_operand.vmem [shape: bf16[9,64,64], index: 0, kind: input, shape index: {}]   ;;  %s921_s1 = inlined_call_operand.vmem [shape: bf16[64,1152], index: 1, kind: input, shape index: {}]   ;;  %s922_s2 = inlined_call_operand.vmem [shape: f32[1,128], index: 2, kind: input, shape index: {}]   ;;  %s923_s3 = inlined_call_operand.vmem [shape: f32[64,128], index: 3, kind: output, shape index: {}]  }
   0x1   :  { %s727_s14 = smov 0   ;;  %s729_s15 = smov 0  }
   0x2   :  { %s731_s16 = smov 0  }
   0x3 LB: > { %s22_s17 = sadd.s32 1, %s696_s15  ;;  %p67_p1 = scmp.ne.s32.totalorder %s688_s13, %s684_s12  ;;  %s700_s16 = sphi %s731_s16, %s13_s16   ;;  %s696_s15 = sphi %s729_s15, %s927_s15   ;;  %s692_s14 = sphi %s727_s14, %s926_s14   ;;  %s688_s13 = sphi %s725_s13, %s925_s13   ;;  %s684_s12 = sphi %s723_s12, %s924_s12  }
   0x4   : > { %p23_p0 = scmp.ge.s32.totalorder %s22_s17, 9  ;;  %p68_p2 = scmp.eq.s32.totalorder %s700_s16, 0 }
   0x5   : > { %s60_s19 = sadd.s32 1, %s688_s13  ;;  %p550_p5 = scmp.ge.s32.totalorder %s700_s16, 9 }
   0x6   : > { %s929_s17 = smov (%p23_p0, %s22_s17), 0  ;;  %p69_p3 = por %p68_p2, %p67_p1 }
   0x7   : > { %s57_s18 = ssub.s32 %s696_s15, %s929_s17  ;;  %143 = sbr.rel (%p550_p5) target bundleno = 24 (0x18), region = 20 }
   0x8   : > { %p58_p4 = scmp.eq.s32.totalorder %s57_s18, 0 }
   0xa   : > { %s758_s20 = scalar_select %p58_p4, %s688_s13, %s60_s19  }
   0xc   : > { %159 = sbr.rel (!%p69_p3) target bundleno = 24 (0x18), region = 28  ;;  %s161_s21 = sand.u32 (%p69_p3), 1, %s688_s13  }
   0xd   : > { %s552_s22 = sshll.u32 (%p69_p3), %s696_s15, 2  ;;  %s551_s23 = sshll.u32 (%p69_p3), %s161_s21, 5 }
   0xe   : > { %s165_s26 = scalar_lea.vmem (%p69_p3), %s921_s1, %s552_s22  ;;  %s163_s27 = scalar_lea.vmem (%p69_p3), [#allocation2], %s551_s23 }
   0xf   : > { %v182_v0 = vld [vmem:[%s165_s26] sm:$0xf] (%p69_p3)  ;;  %v184_v1 = vld [vmem:[%s165_s26 + $0x24] sm:$0xf] (%p69_p3)  ;;  %v186_v2 = vld [vmem:[%s165_s26 + $0x48] sm:$0xf] (%p69_p3) }
  0x10   : > { %183 = vst [vmem:[%s163_s27] sm:$0xf] (%p69_p3), %v182_v0  ;;  %v188_v3 = vld [vmem:[%s165_s26 + $0x6c] sm:$0xf] (%p69_p3)  ;;  %v190_v4 = vld [vmem:[%s165_s26 + $0x90] sm:$0xf] (%p69_p3) }
  0x11   : > { %185 = vst [vmem:[%s163_s27 + $0x4] sm:$0xf] %v184_v1  ;;  %v192_v5 = vld [vmem:[%s165_s26 + $0xb4] sm:$0xf]  ;;  %v194_v6 = vld [vmem:[%s165_s26 + $0xd8] sm:$0xf] }
  0x12   : > { %187 = vst [vmem:[%s163_s27 + $0x8] sm:$0xf] %v186_v2  ;;  %v196_v7 = vld [vmem:[%s165_s26 + $0xfc] sm:$0xf] }
  0x13   : > { %189 = vst [vmem:[%s163_s27 + $0xc] sm:$0xf] %v188_v3 }
  0x14   : > { %191 = vst [vmem:[%s163_s27 + $0x10] sm:$0xf] %v190_v4 }
  0x15   : > { %193 = vst [vmem:[%s163_s27 + $0x14] sm:$0xf] %v192_v5 }
  0x16   : > { %195 = vst [vmem:[%s163_s27 + $0x18] sm:$0xf] %v194_v6 }
  0x17   : > { %197 = vst [vmem:[%s163_s27 + $0x1c] sm:$0xf] %v196_v7 }
  0x18 PF: > { %p553_p6 = scmp.ge.s32.totalorder %s700_s16, 1  ;;  %p236_p7 = scmp.lt.s32.totalorder %s700_s16, 10 }
  0x1a   : > { %p237_p8 = pnand %p553_p6, %p236_p7 }
  0x1b   : > { %s243_s28 = sand.u32 (!%p237_p8), 1, %s684_s12   ;;  %p276_p9 = scmp.lt.s32.totalorder (!%p237_p8), %s692_s14, 8 }
  0x1c   : > { %240 = sbr.rel (%p237_p8) target bundleno = 221 (0xdd), region = 69  ;;  %s554_s29 = sshll.u32 (!%p237_p8), %s243_s28, 5 }
  0x1d   : > { %s245_s8 = scalar_lea.vmem (!%p237_p8), [#allocation2], %s554_s29  ;;  %p557_p10 = scmp.ne.s32.totalorder (!%p237_p8), %s692_s14, 0 }
  0x21   : > { %s277_s30 = scalar_select %p276_p9, %s692_s14, 8 }
  0x22   : > { %295 = sbr.rel (%p557_p10) target bundleno = 48 (0x30), region = 77 }
  0x23   : > { %s599_s4 = sshll.u32 %s277_s30, 5 }
  0x24   : > { %s774_s7 = scalar_lea.vmem %s920_s0, %s599_s4 }
  0x27   : > { %v702_v8 = vmov 0.0  }
  0x28   : > { %296 = vst [vmem:[%s923_s3] sm:$0xff] %v702_v8 }
  0x29   : > { %297 = vst [vmem:[%s923_s3 + $0x8] sm:$0xff] %v702_v8 }
  0x2a   : > { %298 = vst [vmem:[%s923_s3 + $0x10] sm:$0xff] %v702_v8 }
  0x2b   : > { %299 = vst [vmem:[%s923_s3 + $0x18] sm:$0xff] %v702_v8 }
  0x2c   : > { %300 = vst [vmem:[%s923_s3 + $0x20] sm:$0xff] %v702_v8 }
  0x2d   : > { %301 = vst [vmem:[%s923_s3 + $0x28] sm:$0xff] %v702_v8 }
  0x2e   : > { %302 = vst [vmem:[%s923_s3 + $0x30] sm:$0xff] %v702_v8 }
  0x2f   : > { %303 = vst [vmem:[%s923_s3 + $0x38] sm:$0xff] %v702_v8 }
  0x30 PF: > { %v607_v9 = vld [vmem:[%s245_s8 + $0x18] sm:$0xff]  ;;  %v606_v10 = vld [vmem:[%s245_s8 + $0x10] sm:$0xff]  ;;  %v605_v11 = vld [vmem:[%s245_s8 + $0x8] sm:$0xff]  ;;  %vm372_vm0 = vcmask 523264   ;;  %p594_p11 = scmp.ne.s32.totalorder %s692_s14, 8 }
  0x31   : > { %389 = vmatpush.bf16.msra.mxu0 %v607_v9  ;;  %608 = vmatpush.bf16.msra.mxu1 %v607_v9  ;;  %v604_v12 = vld [vmem:[%s245_s8] sm:$0xff]  ;;  %v601_v14 = vld [vmem:[%s774_s7 + $0x8] sm:$0xff]  ;;  %v602_v15 = vld [vmem:[%s774_s7 + $0x10] sm:$0xff] }
  0x32   : > { %609 = vmatpush.bf16.msra.mxu2 %v607_v9  ;;  %610 = vmatpush.bf16.msra.mxu3 %v607_v9  ;;  %v600_v13 = vld [vmem:[%s774_s7] sm:$0xff]  ;;  %v603_v16 = vld [vmem:[%s774_s7 + $0x18] sm:$0xff]  ;;  %v306_v18 = vld [vmem:[%s923_s3 + $0x10] sm:$0xff] }
  0x33   : > { %v304_v17 = vld [vmem:[%s923_s3] sm:$0xff]  ;;  %v305_v25 = vld [vmem:[%s923_s3 + $0x8] sm:$0xff]  ;;  %v307_v26 = vld [vmem:[%s923_s3 + $0x18] sm:$0xff] }
  0x34   : > { %v308_v23 = vld [vmem:[%s923_s3 + $0x20] sm:$0xff]  ;;  %v309_v35 = vld [vmem:[%s923_s3 + $0x28] sm:$0xff] }
  0x35   : > { %390 = vmatpush.bf16.msra.mxu0 %v606_v10  ;;  %611 = vmatpush.bf16.msra.mxu1 %v606_v10  ;;  %v310_v24 = vld [vmem:[%s923_s3 + $0x30] sm:$0xff] }
  0x36   : > { %612 = vmatpush.bf16.msra.mxu2 %v606_v10  ;;  %613 = vmatpush.bf16.msra.mxu3 %v606_v10  ;;  %v311_v36 = vld [vmem:[%s923_s3 + $0x38] sm:$0xff] }
  0x39   : > { %391 = vmatpush.bf16.msra.mxu0 %v605_v11  ;;  %614 = vmatpush.bf16.msra.mxu1 %v605_v11 }
  0x3a   : > { %615 = vmatpush.bf16.msra.mxu2 %v605_v11  ;;  %616 = vmatpush.bf16.msra.mxu3 %v605_v11 }
  0x3d   : > { %392 = vmatpush.bf16.msra.mxu0 %v604_v12  ;;  %617 = vmatpush.bf16.msra.mxu1 %v604_v12 }
  0x3e   : > { %618 = vmatpush.bf16.msra.mxu2 %v604_v12  ;;  %619 = vmatpush.bf16.msra.mxu3 %v604_v12 }
  0x40   : > { %590 = vmatmul.msk.bf16.vlgmr.msra.gmra.mxu0 %vm372_vm0, %v600_v13  ;;  %591 = vmatmul.msk.bf16.vlgmr.msra.gmra.mxu1 %vm372_vm0, %v601_v14 }
  0x41   : > { %592 = vmatmul.msk.bf16.vlgmr.msra.gmra.mxu2 %vm372_vm0, %v602_v15  ;;  %593 = vmatmul.msk.bf16.vlgmr.msra.gmra.mxu3 %vm372_vm0, %v603_v16 }
  0xbd   : > { %v394_v19 = vpop.f32.mrf.mxu0  ;;  %v399_v20 = vpop.f32.mrf.mxu1 }
  0xbe   : > { %v414_v21 = vadd.f32 %v394_v19, %v304_v17  ;;  %v416_v22 = vadd.f32 %v399_v20, %v306_v18 }
  0xc0   : > { %422 = vst [vmem:[%s923_s3] sm:$0xff] %v414_v21 }
  0xc1   : > { %424 = vst [vmem:[%s923_s3 + $0x10] sm:$0xff] %v416_v22 }
  0xc4   : > { %v404_v27 = vpop.f32.mrf.mxu2  ;;  %v409_v28 = vpop.f32.mrf.mxu3 }
  0xc5   : > { %v418_v29 = vadd.f32 %v404_v27, %v308_v23  ;;  %v420_v30 = vadd.f32 %v409_v28, %v310_v24  ;;  %v396_v31 = vpop.f32.mrf.mxu0  ;;  %v401_v32 = vpop.f32.mrf.mxu1 }
  0xc6   : > { %v415_v33 = vadd.f32 %v396_v31, %v305_v25  ;;  %v417_v34 = vadd.f32 %v401_v32, %v307_v26 }
  0xc7   : > { %426 = vst [vmem:[%s923_s3 + $0x20] sm:$0xff] %v418_v29 }
  0xc8   : > { %428 = vst [vmem:[%s923_s3 + $0x30] sm:$0xff] %v420_v30 }
  0xc9   : > { %423 = vst [vmem:[%s923_s3 + $0x8] sm:$0xff] %v415_v33 }
  0xca   : > { %425 = vst [vmem:[%s923_s3 + $0x18] sm:$0xff] %v417_v34 }
  0xcc   : > { %v406_v37 = vpop.f32.mrf.mxu2  ;;  %v411_v38 = vpop.f32.mrf.mxu3  ;;  %433 = sbr.rel (%p594_p11) target bundleno = 221 (0xdd), region = 81 }
  0xcd   : > { %v419_v39 = vadd.f32 %v406_v37, %v309_v35  ;;  %v421_v40 = vadd.f32 %v411_v38, %v311_v36 }
  0xcf   : > { %427 = vst [vmem:[%s923_s3 + $0x28] sm:$0xff] %v419_v39 }
  0xd0   : > { %429 = vst [vmem:[%s923_s3 + $0x38] sm:$0xff] %v421_v40 }
  0xd1   : > { %v434_v41 = vld [vmem:[%s923_s3] sm:$0xff]  ;;  %v435_v43 = vld [vmem:[%s923_s3 + $0x8] sm:$0xff]  ;;  %v436_v44 = vld [vmem:[%s923_s3 + $0x10] sm:$0xff] }
  0xd2   : > { %v661_v42 = vld [vmem:[%s922_s2] ss:$0 sm:$0xff]  ;;  %v437_v45 = vld [vmem:[%s923_s3 + $0x18] sm:$0xff]  ;;  %v440_v52 = vld [vmem:[%s923_s3 + $0x30] sm:$0xff] }
  0xd3   : > { %v446_v46 = vadd.f32 %v661_v42, %v434_v41  ;;  %v447_v47 = vadd.f32 %v661_v42, %v435_v43  ;;  %v448_v48 = vadd.f32 %v661_v42, %v436_v44  ;;  %v438_v49 = vld [vmem:[%s923_s3 + $0x20] sm:$0xff]  ;;  %v449_v51 = vadd.f32 %v661_v42, %v437_v45 }
  0xd4   : > { %v450_v53 = vadd.f32 %v661_v42, %v438_v49  ;;  %v452_v56 = vadd.f32 %v661_v42, %v440_v52 }
  0xd5   : > { %454 = vst [vmem:[%s923_s3] sm:$0xff] %v446_v46 }
  0xd6   : > { %v439_v50 = vld [vmem:[%s923_s3 + $0x28] sm:$0xff]  ;;  %455 = vst [vmem:[%s923_s3 + $0x8] sm:$0xff] %v447_v47 }
  0xd7   : > { %v441_v54 = vld [vmem:[%s923_s3 + $0x38] sm:$0xff]  ;;  %v451_v55 = vadd.f32 %v661_v42, %v439_v50  ;;  %456 = vst [vmem:[%s923_s3 + $0x10] sm:$0xff] %v448_v48 }
  0xd8   : > { %457 = vst [vmem:[%s923_s3 + $0x18] sm:$0xff] %v449_v51  ;;  %v453_v57 = vadd.f32 %v661_v42, %v441_v54 }
  0xd9   : > { %458 = vst [vmem:[%s923_s3 + $0x20] sm:$0xff] %v450_v53 }
  0xda   : > { %459 = vst [vmem:[%s923_s3 + $0x28] sm:$0xff] %v451_v55 }
  0xdb   : > { %460 = vst [vmem:[%s923_s3 + $0x30] sm:$0xff] %v452_v56 }
  0xdc   : > { %461 = vst [vmem:[%s923_s3 + $0x38] sm:$0xff] %v453_v57 }
  0xdd PF: > { %s13_s16 = sadd.s32 1, %s700_s16   ;;  %s924_s12 = smov %s688_s13 }
  0xde   : > { %p10_p12 = scmp.ge.s32.totalorder %s13_s16, 11   ;;  %s925_s13 = smov %s758_s20 }
  0xdf   : > { %s926_s14 = smov %s696_s15  ;;  %s927_s15 = smov %s929_s17 }
  0xe0   :  { %12 = sbr.rel (!%p10_p12) target bundleno = 3 (0x3), region = 119 }

// kernel: forward.2
= control target key start
LH: loop header
LB: loop body
LE: loop exit
PB: predicated region body
PF: predicated region fallthrough
CT: control target
= control target key end

     0   :  { %s1928_s15 = smov 0   ;;  %s1930_s16 = smov 0   ;;  %s2647_s0 = inlined_call_operand.vmem [shape: bf16[9,64,64], index: 0, kind: input, shape index: {}]   ;;  %s2648_s1 = inlined_call_operand.vmem [shape: bf16[64,1152], index: 1, kind: input, shape index: {}]   ;;  %s2649_s2 = inlined_call_operand.vmem [shape: f32[1,128], index: 2, kind: input, shape index: {}]   ;;  %s2650_s3 = inlined_call_operand.vmem [shape: bf16[128,1152], index: 3, kind: input, shape index: {}]   ;;  %s2651_s4 = inlined_call_operand.vmem [shape: bf16[64,1152], index: 4, kind: output, shape index: {}]  }
   0x1   :  { %s1932_s17 = smov 0   ;;  %s1934_s18 = smov 0  }
   0x2   :  { %s1936_s19 = smov 0  }
   0x3 LB: > { %s23_s20 = sadd.s32 1, %s1896_s18  ;;  %p68_p1 = scmp.ne.s32.totalorder %s1888_s16, %s1884_s15  ;;  %s1900_s19 = sphi %s1936_s19, %s14_s19   ;;  %s1896_s18 = sphi %s1934_s18, %s2655_s18   ;;  %s1892_s17 = sphi %s1932_s17, %s2654_s17   ;;  %s1888_s16 = sphi %s1930_s16, %s2653_s16   ;;  %s1884_s15 = sphi %s1928_s15, %s2652_s15  }
   0x4   : > { %p24_p0 = scmp.ge.s32.totalorder %s23_s20, 9  ;;  %p69_p2 = scmp.eq.s32.totalorder %s1900_s19, 0 }
   0x5   : > { %s61_s22 = sadd.s32 1, %s1888_s16  ;;  %p1374_p5 = scmp.ge.s32.totalorder %s1900_s19, 9 }
   0x6   : > { %s2657_s20 = smov (%p24_p0, %s23_s20), 0  ;;  %p70_p3 = por %p69_p2, %p68_p1 }
   0x7   : > { %s58_s21 = ssub.s32 %s1896_s18, %s2657_s20  ;;  %168 = sbr.rel (%p1374_p5) target bundleno = 24 (0x18), region = 24 }
   0x8   : > { %p59_p4 = scmp.eq.s32.totalorder %s58_s21, 0 }
   0xa   : > { %s1963_s23 = scalar_select %p59_p4, %s1888_s16, %s61_s22  }
   0xc   : > { %184 = sbr.rel (!%p70_p3) target bundleno = 24 (0x18), region = 32  ;;  %s186_s24 = sand.u32 (%p70_p3), 1, %s1888_s16  }
   0xd   : > { %s1376_s25 = sshll.u32 (%p70_p3), %s1896_s18, 2  ;;  %s1375_s26 = sshll.u32 (%p70_p3), %s186_s24, 5 }
   0xe   : > { %s190_s29 = scalar_lea.vmem (%p70_p3), %s2648_s1, %s1376_s25  ;;  %s188_s30 = scalar_lea.vmem (%p70_p3), [#allocation3], %s1375_s26 }
   0xf   : > { %v207_v0 = vld [vmem:[%s190_s29] sm:$0xf] (%p70_p3)  ;;  %v209_v1 = vld [vmem:[%s190_s29 + $0x24] sm:$0xf] (%p70_p3)  ;;  %v211_v2 = vld [vmem:[%s190_s29 + $0x48] sm:$0xf] (%p70_p3) }
  0x10   : > { %208 = vst [vmem:[%s188_s30] sm:$0xf] (%p70_p3), %v207_v0  ;;  %v213_v3 = vld [vmem:[%s190_s29 + $0x6c] sm:$0xf] (%p70_p3)  ;;  %v215_v4 = vld [vmem:[%s190_s29 + $0x90] sm:$0xf] (%p70_p3) }
  0x11   : > { %210 = vst [vmem:[%s188_s30 + $0x4] sm:$0xf] %v209_v1  ;;  %v217_v5 = vld [vmem:[%s190_s29 + $0xb4] sm:$0xf]  ;;  %v219_v6 = vld [vmem:[%s190_s29 + $0xd8] sm:$0xf] }
  0x12   : > { %212 = vst [vmem:[%s188_s30 + $0x8] sm:$0xf] %v211_v2  ;;  %v221_v7 = vld [vmem:[%s190_s29 + $0xfc] sm:$0xf] }
  0x13   : > { %214 = vst [vmem:[%s188_s30 + $0xc] sm:$0xf] %v213_v3 }
  0x14   : > { %216 = vst [vmem:[%s188_s30 + $0x10] sm:$0xf] %v215_v4 }
  0x15   : > { %218 = vst [vmem:[%s188_s30 + $0x14] sm:$0xf] %v217_v5 }
  0x16   : > { %220 = vst [vmem:[%s188_s30 + $0x18] sm:$0xf] %v219_v6 }
  0x17   : > { %222 = vst [vmem:[%s188_s30 + $0x1c] sm:$0xf] %v221_v7 }
  0x18 PF: > { %p1377_p6 = scmp.ge.s32.totalorder %s1900_s19, 1  ;;  %p261_p7 = scmp.lt.s32.totalorder %s1900_s19, 10 }
  0x1a   : > { %p262_p8 = pnand %p1377_p6, %p261_p7 }
  0x1b   : > { %s268_s5 = sand.u32 (!%p262_p8), 1, %s1884_s15   ;;  %p304_p9 = scmp.lt.s32.totalorder (!%p262_p8), %s1892_s17, 8 }
  0x1c   : > { %265 = sbr.rel (%p262_p8) target bundleno = 525 (0x20d), region = 73  ;;  %s1378_s6 = sshll.u32 (!%p262_p8), %s268_s5, 5 }
  0x1d   : > { %s270_s12 = scalar_lea.vmem (!%p262_p8), [#allocation3], %s1378_s6  ;;  %p1381_p10 = scmp.ne.s32.totalorder (!%p262_p8), %s1892_s17, 0 }
  0x21   : > { %s305_s7 = scalar_select %p304_p9, %s1892_s17, 8 }
  0x22   : > { %324 = sbr.rel (%p1381_p10) target bundleno = 48 (0x30), region = 81 }
  0x23   : > { %s1711_s8 = sshll.u32 %s305_s7, 5 }
  0x24   : > { %s1979_s11 = scalar_lea.vmem %s2647_s0, %s1711_s8 }
  0x27   : > { %v1902_v8 = vmov 0.0  }
  0x28   : > { %325 = vst [vmem:[#allocation2 + $0x30] sm:$0xff] %v1902_v8 }
  0x29   : > { %326 = vst [vmem:[#allocation2] sm:$0xff] %v1902_v8 }
  0x2a   : > { %327 = vst [vmem:[#allocation2 + $0x18] sm:$0xff] %v1902_v8 }
  0x2b   : > { %328 = vst [vmem:[#allocation2 + $0x10] sm:$0xff] %v1902_v8 }
  0x2c   : > { %329 = vst [vmem:[#allocation2 + $0x8] sm:$0xff] %v1902_v8 }
  0x2d   : > { %330 = vst [vmem:[#allocation2 + $0x20] sm:$0xff] %v1902_v8 }
  0x2e   : > { %331 = vst [vmem:[#allocation2 + $0x28] sm:$0xff] %v1902_v8 }
  0x2f   : > { %332 = vst [vmem:[#allocation2 + $0x38] sm:$0xff] %v1902_v8 }
  0x30 PF: > { %v1719_v9 = vld [vmem:[%s270_s12 + $0x18] sm:$0xff]  ;;  %v1718_v10 = vld [vmem:[%s270_s12 + $0x10] sm:$0xff]  ;;  %v1717_v11 = vld [vmem:[%s270_s12 + $0x8] sm:$0xff]  ;;  %vm401_vm0 = vcmask 523264   ;;  %p1418_p11 = scmp.ne.s32.totalorder %s1892_s17, 8 }
  0x31   : > { %418 = vmatpush.bf16.msra.mxu0 %v1719_v9  ;;  %1792 = vmatpush.bf16.msra.mxu1 %v1719_v9  ;;  %v1716_v12 = vld [vmem:[%s270_s12] sm:$0xff]  ;;  %v1713_v14 = vld [vmem:[%s1979_s11 + $0x8] sm:$0xff]  ;;  %v1714_v15 = vld [vmem:[%s1979_s11 + $0x10] sm:$0xff] }
  0x32   : > { %1793 = vmatpush.bf16.msra.mxu2 %v1719_v9  ;;  %1794 = vmatpush.bf16.msra.mxu3 %v1719_v9  ;;  %v1712_v13 = vld [vmem:[%s1979_s11] sm:$0xff]  ;;  %v1715_v16 = vld [vmem:[%s1979_s11 + $0x18] sm:$0xff]  ;;  %v333_v17 = vld [vmem:[#allocation2 + $0x30] sm:$0xff] }
  0x33   : > { %v335_v18 = vld [vmem:[#allocation2 + $0x18] sm:$0xff]  ;;  %v337_v23 = vld [vmem:[#allocation2 + $0x8] sm:$0xff]  ;;  %v334_v25 = vld [vmem:[#allocation2] sm:$0xff] }
  0x34   : > { %v336_v26 = vld [vmem:[#allocation2 + $0x10] sm:$0xff]  ;;  %v338_v35 = vld [vmem:[#allocation2 + $0x20] sm:$0xff] }
  0x35   : > { %419 = vmatpush.bf16.msra.mxu0 %v1718_v10  ;;  %1795 = vmatpush.bf16.msra.mxu1 %v1718_v10  ;;  %v339_v24 = vld [vmem:[#allocation2 + $0x28] sm:$0xff] }
  0x36   : > { %1796 = vmatpush.bf16.msra.mxu2 %v1718_v10  ;;  %1797 = vmatpush.bf16.msra.mxu3 %v1718_v10  ;;  %v340_v36 = vld [vmem:[#allocation2 + $0x38] sm:$0xff] }
  0x39   : > { %420 = vmatpush.bf16.msra.mxu0 %v1717_v11  ;;  %1798 = vmatpush.bf16.msra.mxu1 %v1717_v11 }
  0x3a   : > { %1799 = vmatpush.bf16.msra.mxu2 %v1717_v11  ;;  %1800 = vmatpush.bf16.msra.mxu3 %v1717_v11 }
  0x3d   : > { %421 = vmatpush.bf16.msra.mxu0 %v1716_v12  ;;  %1801 = vmatpush.bf16.msra.mxu1 %v1716_v12 }
  0x3e   : > { %1802 = vmatpush.bf16.msra.mxu2 %v1716_v12  ;;  %1803 = vmatpush.bf16.msra.mxu3 %v1716_v12 }
  0x40   : > { %1414 = vmatmul.msk.bf16.vlgmr.msra.gmra.mxu0 %vm401_vm0, %v1712_v13  ;;  %1415 = vmatmul.msk.bf16.vlgmr.msra.gmra.mxu1 %vm401_vm0, %v1713_v14 }
  0x41   : > { %1416 = vmatmul.msk.bf16.vlgmr.msra.gmra.mxu2 %vm401_vm0, %v1714_v15  ;;  %1417 = vmatmul.msk.bf16.vlgmr.msra.gmra.mxu3 %vm401_vm0, %v1715_v16 }
  0xbd   : > { %v423_v19 = vpop.f32.mrf.mxu0  ;;  %v428_v20 = vpop.f32.mrf.mxu1 }
  0xbe   : > { %v443_v21 = vadd.f32 %v423_v19, %v333_v17  ;;  %v445_v22 = vadd.f32 %v428_v20, %v335_v18 }
  0xc0   : > { %451 = vst [vmem:[#allocation2 + $0x30] sm:$0xff] %v443_v21 }
  0xc1   : > { %453 = vst [vmem:[#allocation2 + $0x18] sm:$0xff] %v445_v22 }
  0xc4   : > { %v433_v27 = vpop.f32.mrf.mxu2  ;;  %v438_v28 = vpop.f32.mrf.mxu3 }
  0xc5   : > { %v447_v29 = vadd.f32 %v433_v27, %v337_v23  ;;  %v449_v30 = vadd.f32 %v438_v28, %v339_v24  ;;  %v425_v31 = vpop.f32.mrf.mxu0  ;;  %v430_v32 = vpop.f32.mrf.mxu1 }
  0xc6   : > { %v444_v33 = vadd.f32 %v425_v31, %v334_v25  ;;  %v446_v34 = vadd.f32 %v430_v32, %v336_v26 }
  0xc7   : > { %455 = vst [vmem:[#allocation2 + $0x8] sm:$0xff] %v447_v29 }
  0xc8   : > { %457 = vst [vmem:[#allocation2 + $0x28] sm:$0xff] %v449_v30 }
  0xc9   : > { %452 = vst [vmem:[#allocation2] sm:$0xff] %v444_v33 }
  0xca   : > { %454 = vst [vmem:[#allocation2 + $0x10] sm:$0xff] %v446_v34 }
  0xcc   : > { %v435_v37 = vpop.f32.mrf.mxu2  ;;  %v440_v38 = vpop.f32.mrf.mxu3  ;;  %462 = sbr.rel (%p1418_p11) target bundleno = 525 (0x20d), region = 85 }
  0xcd   : > { %v448_v39 = vadd.f32 %v435_v37, %v338_v35  ;;  %v450_v40 = vadd.f32 %v440_v38, %v340_v36 }
  0xcf   : > { %456 = vst [vmem:[#allocation2 + $0x20] sm:$0xff] %v448_v39 }
  0xd0   : > { %458 = vst [vmem:[#allocation2 + $0x38] sm:$0xff] %v450_v40 }
  0xd1   : > { %v1673_v41 = vld [vmem:[%s2650_s3 + $0x1f8] sm:$0xf]  ;;  %v1787_v42 = vld [vmem:[%s2650_s3 + $0x218] sm:$0xf0]  ;;  %v1681_v43 = vld [vmem:[%s2650_s3 + $0x200] sm:$0xf] }
  0xd2   : > { %v1674_v44 = vor.u32 %v1787_v42, %v1673_v41  ;;  %v1788_v45 = vld [vmem:[%s2650_s3 + $0x220] sm:$0xf0]  ;;  %v1683_v47 = vld [vmem:[%s2650_s3 + $0x224] sm:$0xf0]  ;;  %v1637_v50 = vld [vmem:[%s2650_s3 + $0x1b0] sm:$0xf] }
  0xd3   : > { %v1784_v46 = vld [vmem:[%s2650_s3 + $0x204] sm:$0xf]  ;;  %v1682_v48 = vor.u32 %v1788_v45, %v1681_v43  ;;  %v1778_v51 = vld [vmem:[%s2650_s3 + $0x1d0] sm:$0xf0]  ;;  %v1645_v52 = vld [vmem:[%s2650_s3 + $0x1b8] sm:$0xf] }
  0xd4   : > { %v1686_v49 = vor.u32 %v1784_v46, %v1683_v47  ;;  %1804 = vmatpush.bf16.msra.mxu1 %v1674_v44  ;;  %v1638_v53 = vor.u32 %v1778_v51, %v1637_v50  ;;  %v1779_v54 = vld [vmem:[%s2650_s3 + $0x1d8] sm:$0xf0]  ;;  %v1647_v56 = vld [vmem:[%s2650_s3 + $0x1dc] sm:$0xf0]  ;;  %943 = vmatpush.bf16.msra.mxu0 %v1674_v44  ;;  %v1601_v59 = vld [vmem:[%s2650_s3 + $0x168] sm:$0xf] }
  0xd5   : > { %v1775_v55 = vld [vmem:[%s2650_s3 + $0x1bc] sm:$0xf]  ;;  %1001 = vmatpush.bf16.msra.mxu2 %v1682_v48  ;;  %v1646_v57 = vor.u32 %v1779_v54, %v1645_v52  ;;  %v1769_v60 = vld [vmem:[%s2650_s3 + $0x188] sm:$0xf0]  ;;  %v1609_v61 = vld [vmem:[%s2650_s3 + $0x170] sm:$0xf] }
  0xd6   : > { %1030 = vmatpush.bf16.msra.mxu3 %v1686_v49  ;;  %v1650_v58 = vor.u32 %v1775_v55, %v1647_v56  ;;  %v1770_v62 = vld [vmem:[%s2650_s3 + $0x190] sm:$0xf0]  ;;  %v1611_v0 = vld [vmem:[%s2650_s3 + $0x194] sm:$0xf0]  ;;  %v1602_v1 = vor.u32 %v1769_v60, %v1601_v59  ;;  %v1565_v4 = vld [vmem:[%s2650_s3 + $0x120] sm:$0xf] }
  0xd7   : > { %v1766_v63 = vld [vmem:[%s2650_s3 + $0x174] sm:$0xf]  ;;  %v1610_v2 = vor.u32 %v1770_v62, %v1609_v61  ;;  %v1760_v5 = vld [vmem:[%s2650_s3 + $0x140] sm:$0xf0]  ;;  %v1573_v6 = vld [vmem:[%s2650_s3 + $0x128] sm:$0xf] }
  0xd8   : > { %1805 = vmatpush.bf16.msra.mxu1 %v1638_v53  ;;  %944 = vmatpush.bf16.msra.mxu0 %v1638_v53  ;;  %v1614_v3 = vor.u32 %v1766_v63, %v1611_v0  ;;  %v1761_v7 = vld [vmem:[%s2650_s3 + $0x148] sm:$0xf0]  ;;  %v1575_v9 = vld [vmem:[%s2650_s3 + $0x14c] sm:$0xf0]  ;;  %v1566_v10 = vor.u32 %v1760_v5, %v1565_v4  ;;  %v1529_v13 = vld [vmem:[%s2650_s3 + $0xd8] sm:$0xf] }
  0xd9   : > { %1002 = vmatpush.bf16.msra.mxu2 %v1646_v57  ;;  %v1757_v8 = vld [vmem:[%s2650_s3 + $0x12c] sm:$0xf]  ;;  %v1574_v11 = vor.u32 %v1761_v7, %v1573_v6  ;;  %v1751_v14 = vld [vmem:[%s2650_s3 + $0xf8] sm:$0xf0]  ;;  %v1537_v15 = vld [vmem:[%s2650_s3 + $0xe0] sm:$0xf] }
  0xda   : > { %1031 = vmatpush.bf16.msra.mxu3 %v1650_v58  ;;  %v1578_v12 = vor.u32 %v1757_v8, %v1575_v9  ;;  %v1752_v16 = vld [vmem:[%s2650_s3 + $0x100] sm:$0xf0]  ;;  %v1539_v18 = vld [vmem:[%s2650_s3 + $0x104] sm:$0xf0]  ;;  %v1530_v19 = vor.u32 %v1751_v14, %v1529_v13  ;;  %v1493_v20 = vld [vmem:[%s2650_s3 + $0x90] sm:$0xf] }
  0xdb   : > { %v1748_v17 = vld [vmem:[%s2650_s3 + $0xe4] sm:$0xf]  ;;  %v1538_v21 = vor.u32 %v1752_v16, %v1537_v15  ;;  %v1742_v23 = vld [vmem:[%s2650_s3 + $0xb0] sm:$0xf0]  ;;  %v1501_v24 = vld [vmem:[%s2650_s3 + $0x98] sm:$0xf] }
  0xdc   : > { %1806 = vmatpush.bf16.msra.mxu1 %v1602_v1  ;;  %945 = vmatpush.bf16.msra.mxu0 %v1602_v1  ;;  %v1542_v22 = vor.u32 %v1748_v17, %v1539_v18  ;;  %v1743_v25 = vld [vmem:[%s2650_s3 + $0xb8] sm:$0xf0]  ;;  %v1503_v27 = vld [vmem:[%s2650_s3 + $0xbc] sm:$0xf0]  ;;  %v1457_v28 = vld [vmem:[%s2650_s3 + $0x48] sm:$0xf]  ;;  %v1494_v30 = vor.u32 %v1742_v23, %v1493_v20 }
  0xdd   : > { %1003 = vmatpush.bf16.msra.mxu2 %v1610_v2  ;;  %v1739_v26 = vld [vmem:[%s2650_s3 + $0x9c] sm:$0xf]  ;;  %v2101_v29 = vld [vmem:[%s2649_s2] ss:$0 sm:$0xff]  ;;  %v1733_v31 = vld [vmem:[%s2650_s3 + $0x68] sm:$0xf0]  ;;  %v1502_v34 = vor.u32 %v1743_v25, %v1501_v24 }
  0xde   : > { %1032 = vmatpush.bf16.msra.mxu3 %v1614_v3  ;;  %v467_v32 = vld [vmem:[#allocation2 + $0x8] sm:$0xff]  ;;  %v468_v33 = vld [vmem:[#allocation2 + $0x20] sm:$0xff]  ;;  %v1506_v35 = vor.u32 %v1739_v26, %v1503_v27  ;;  %v1465_v36 = vld [vmem:[%s2650_s3 + $0x50] sm:$0xf]  ;;  %v1458_v44 = vor.u32 %v1733_v31, %v1457_v28 }
  0xdf   : > { %v463_v37 = vld [vmem:[#allocation2 + $0x30] sm:$0xff]  ;;  %v464_v38 = vld [vmem:[#allocation2] sm:$0xff]  ;;  %v1467_v41 = vld [vmem:[%s2650_s3 + $0x74] sm:$0xf0]  ;;  %v479_v42 = vadd.f32 %v2101_v29, %v467_v32  ;;  %v480_v43 = vadd.f32 %v2101_v29, %v468_v33 }
  0xe0   : > { %1807 = vmatpush.bf16.msra.mxu1 %v1566_v10  ;;  %946 = vmatpush.bf16.msra.mxu0 %v1566_v10  ;;  %v1734_v39 = vld [vmem:[%s2650_s3 + $0x70] sm:$0xf0]  ;;  %v1421_v45 = vld [vmem:[%s2650_s3] sm:$0xf]  ;;  %v1724_v46 = vld [vmem:[%s2650_s3 + $0x20] sm:$0xf0]  ;;  %v475_v47 = vadd.f32 %v2101_v29, %v463_v37  ;;  %v476_v48 = vadd.f32 %v2101_v29, %v464_v38 }
  0xe1   : > { %1004 = vmatpush.bf16.msra.mxu2 %v1574_v11  ;;  %v1730_v40 = vld [vmem:[%s2650_s3 + $0x54] sm:$0xf]  ;;  %v1466_v49 = vor.u32 %v1734_v39, %v1465_v36  ;;  %v1429_v51 = vld [vmem:[%s2650_s3 + $0x8] sm:$0xf]  ;;  %v1725_v52 = vld [vmem:[%s2650_s3 + $0x28] sm:$0xf0]  ;;  %v1422_v61 = vor.u32 %v1724_v46, %v1421_v45 }
  0xe2   : > { %1033 = vmatpush.bf16.msra.mxu3 %v1578_v12  ;;  %v1470_v50 = vor.u32 %v1730_v40, %v1467_v41  ;;  %v1721_v53 = vld [vmem:[%s2650_s3 + $0xc] sm:$0xf]  ;;  %v1431_v54 = vld [vmem:[%s2650_s3 + $0x2c] sm:$0xf0]  ;;  %v1783_v55 = vld [vmem:[%s2650_s3 + $0x1fc] sm:$0xf]  ;;  %v1430_v0 = vor.u32 %v1725_v52, %v1429_v51 }
  0xe3   : > { %v1675_v56 = vld [vmem:[%s2650_s3 + $0x21c] sm:$0xf0]  ;;  %v487_v57 = vmax.f32 %v479_v42, 0.0  ;;  %v488_v58 = vmax.f32 %v480_v43, 0.0  ;;  %v1689_v59 = vld [vmem:[%s2650_s3 + $0x208] sm:$0xf]  ;;  %v1434_v1 = vor.u32 %v1721_v53, %v1431_v54 }
  0xe4   : > { %1808 = vmatpush.bf16.msra.mxu1 %v1530_v19  ;;  %947 = vmatpush.bf16.msra.mxu0 %v1530_v19  ;;  %v1789_v60 = vld [vmem:[%s2650_s3 + $0x228] sm:$0xf0]  ;;  %v483_v62 = vmax.f32 %v475_v47, 0.0  ;;  %v484_v63 = vmax.f32 %v476_v48, 0.0  ;;  %v1774_v2 = vld [vmem:[%s2650_s3 + $0x1b4] sm:$0xf]  ;;  %v1678_v4 = vor.u32 %v1783_v55, %v1675_v56 }
  0xe5   : > { %1005 = vmatpush.bf16.msra.mxu2 %v1538_v21  ;;  %v1639_v3 = vld [vmem:[%s2650_s3 + $0x1d4] sm:$0xf0]  ;;  %v1690_v5 = vor.u32 %v1789_v60, %v1689_v59  ;;  %v1697_v6 = vld [vmem:[%s2650_s3 + $0x210] sm:$0xf]  ;;  %v1790_v7 = vld [vmem:[%s2650_s3 + $0x230] sm:$0xf0]  ;;  %v2167_v9 = vpack.c.bf16 %v488_v58, %v487_v57 }
  0xe6   : > { %1034 = vmatpush.bf16.msra.mxu3 %v1542_v22  ;;  %v1653_v8 = vld [vmem:[%s2650_s3 + $0x1c0] sm:$0xf]  ;;  %v1780_v10 = vld [vmem:[%s2650_s3 + $0x1e0] sm:$0xf0]  ;;  %v1786_v11 = vld [vmem:[%s2650_s3 + $0x214] sm:$0xf]  ;;  %v2178_v13 = vpack.c.bf16 %v484_v63, %v483_v62  ;;  %v1698_v14 = vor.u32 %v1790_v7, %v1697_v6  ;;  %v1642_v16 = vor.u32 %v1774_v2, %v1639_v3 }
  0xe7   : > { %v1699_v12 = vld [vmem:[%s2650_s3 + $0x234] sm:$0xf0]  ;;  %v1765_v17 = vld [vmem:[%s2650_s3 + $0x16c] sm:$0xf]  ;;  %v1654_v18 = vor.u32 %v1780_v10, %v1653_v8  ;;  %v1661_v19 = vld [vmem:[%s2650_s3 + $0x1c8] sm:$0xf] }
  0xe8   : > { %1809 = vmatpush.bf16.msra.mxu1 %v1494_v30  ;;  %948 = vmatpush.bf16.msra.mxu0 %v1494_v30  ;;  %v1702_v15 = vor.u32 %v1786_v11, %v1699_v12  ;;  %v1781_v20 = vld [vmem:[%s2650_s3 + $0x1e8] sm:$0xf0]  ;;  %v1603_v21 = vld [vmem:[%s2650_s3 + $0x18c] sm:$0xf0]  ;;  %v1617_v22 = vld [vmem:[%s2650_s3 + $0x178] sm:$0xf] }
  0xe9   : > { %1006 = vmatpush.bf16.msra.mxu2 %v1502_v34  ;;  %v1771_v23 = vld [vmem:[%s2650_s3 + $0x198] sm:$0xf0]  ;;  %v469_v24 = vld [vmem:[#allocation2 + $0x28] sm:$0xff]  ;;  %v1756_v27 = vld [vmem:[%s2650_s3 + $0x124] sm:$0xf]  ;;  %v1662_v32 = vor.u32 %v1781_v20, %v1661_v19  ;;  %v1606_v34 = vor.u32 %v1765_v17, %v1603_v21 }
  0xea   : > { %1035 = vmatpush.bf16.msra.mxu3 %v1506_v35  ;;  %v470_v25 = vld [vmem:[#allocation2 + $0x38] sm:$0xff]  ;;  %v1777_v26 = vld [vmem:[%s2650_s3 + $0x1cc] sm:$0xf]  ;;  %v1567_v28 = vld [vmem:[%s2650_s3 + $0x144] sm:$0xf0]  ;;  %v1618_v35 = vor.u32 %v1771_v23, %v1617_v22  ;;  %v481_v40 = vadd.f32 %v2101_v29, %v469_v24 }
  0xeb   : > { %v465_v30 = vld [vmem:[#allocation2 + $0x18] sm:$0xff]  ;;  %v466_v31 = vld [vmem:[#allocation2 + $0x10] sm:$0xff]  ;;  %v1625_v37 = vld [vmem:[%s2650_s3 + $0x180] sm:$0xf]  ;;  %v482_v41 = vadd.f32 %v2101_v29, %v470_v25  ;;  %v1570_v52 = vor.u32 %v1756_v27, %v1567_v28 }
  0xec   : > { %1810 = vmatpush.bf16.msra.mxu1 %v1458_v44  ;;  %949 = vmatpush.bf16.msra.mxu0 %v1458_v44  ;;  %v1663_v33 = vld [vmem:[%s2650_s3 + $0x1ec] sm:$0xf0]  ;;  %v1772_v38 = vld [vmem:[%s2650_s3 + $0x1a0] sm:$0xf0]  ;;  %v1762_v42 = vld [vmem:[%s2650_s3 + $0x150] sm:$0xf0]  ;;  %v477_v45 = vadd.f32 %v2101_v29, %v465_v30  ;;  %v478_v46 = vadd.f32 %v2101_v29, %v466_v31 }
  0xed   : > { %1007 = vmatpush.bf16.msra.mxu2 %v1466_v49  ;;  %v1581_v36 = vld [vmem:[%s2650_s3 + $0x130] sm:$0xf]  ;;  %v1666_v39 = vor.u32 %v1777_v26, %v1663_v33  ;;  %v1768_v43 = vld [vmem:[%s2650_s3 + $0x184] sm:$0xf]  ;;  %v1627_v44 = vld [vmem:[%s2650_s3 + $0x1a4] sm:$0xf0]  ;;  %v1626_v49 = vor.u32 %v1772_v38, %v1625_v37 }
  0xee   : > { %1036 = vmatpush.bf16.msra.mxu3 %v1470_v50  ;;  %v1747_v47 = vld [vmem:[%s2650_s3 + $0xdc] sm:$0xf]  ;;  %v1531_v48 = vld [vmem:[%s2650_s3 + $0xfc] sm:$0xf0]  ;;  %v1589_v50 = vld [vmem:[%s2650_s3 + $0x138] sm:$0xf]  ;;  %v1630_v51 = vor.u32 %v1768_v43, %v1627_v44  ;;  %v1582_v29 = vor.u32 %v1762_v42, %v1581_v36 }
  0xef   : > { %v1763_v53 = vld [vmem:[%s2650_s3 + $0x158] sm:$0xf0]  ;;  %v1591_v55 = vld [vmem:[%s2650_s3 + $0x15c] sm:$0xf0]  ;;  %v489_v56 = vmax.f32 %v481_v40, 0.0  ;;  %v490_v57 = vmax.f32 %v482_v41, 0.0 }
  0xf0   : > { %1811 = vmatpush.bf16.msra.mxu1 %v1422_v61  ;;  %950 = vmatpush.bf16.msra.mxu0 %v1422_v61  ;;  %v1759_v54 = vld [vmem:[%s2650_s3 + $0x13c] sm:$0xf]  ;;  %v1545_v58 = vld [vmem:[%s2650_s3 + $0xe8] sm:$0xf]  ;;  %v1753_v59 = vld [vmem:[%s2650_s3 + $0x108] sm:$0xf0]  ;;  %v1590_v62 = vor.u32 %v1763_v53, %v1589_v50 }
  0xf1   : > { %1008 = vmatpush.bf16.msra.mxu2 %v1430_v0  ;;  %v485_v60 = vmax.f32 %v477_v45, 0.0  ;;  %v486_v61 = vmax.f32 %v478_v46, 0.0  ;;  %v1594_v63 = vor.u32 %v1759_v54, %v1591_v55  ;;  %v1534_v0 = vor.u32 %v1747_v47, %v1531_v48  ;;  %v1553_v3 = vld [vmem:[%s2650_s3 + $0xf0] sm:$0xf]  ;;  %v1495_v6 = vld [vmem:[%s2650_s3 + $0xb4] sm:$0xf0] }
  0xf2   : > { %1037 = vmatpush.bf16.msra.mxu3 %v1434_v1  ;;  %v1738_v1 = vld [vmem:[%s2650_s3 + $0x94] sm:$0xf]  ;;  %v1546_v2 = vor.u32 %v1753_v59, %v1545_v58  ;;  %v1509_v7 = vld [vmem:[%s2650_s3 + $0xa0] sm:$0xf]  ;;  %v1744_v8 = vld [vmem:[%s2650_s3 + $0xc0] sm:$0xf0] }
  0xf3   : > { %961 = vmatmul.bf16.vlgmr.msra.gmra.mxu1 %v2167_v9  ;;  %951 = vmatmul.bf16.vlgmr.msra.gmra.mxu0 %v2178_v13  ;;  %v2280_v10 = vpack.c.bf16 %v486_v61, %v485_v60  ;;  %v1498_v12 = vor.u32 %v1738_v1, %v1495_v6  ;;  %v1473_v17 = vld [vmem:[%s2650_s3 + $0x58] sm:$0xf]  ;;  %v1517_v19 = vld [vmem:[%s2650_s3 + $0xa8] sm:$0xf]  ;;  %v1745_v20 = vld [vmem:[%s2650_s3 + $0xc8] sm:$0xf0] }
  0xf4   : > { %972 = vmatpush.bf16.msrb.mxu1 %v1678_v4  ;;  %1059 = vmatpush.bf16.msrb.mxu0 %v1690_v5  ;;  %v1754_v4 = vld [vmem:[%s2650_s3 + $0x110] sm:$0xf0]  ;;  %v2269_v5 = vpack.c.bf16 %v490_v57, %v489_v56  ;;  %v1720_v21 = vld [vmem:[%s2650_s3 + $0x4] sm:$0xf]  ;;  %v1423_v22 = vld [vmem:[%s2650_s3 + $0x24] sm:$0xf0]  ;;  %v1518_v23 = vor.u32 %v1745_v20, %v1517_v19 }
  0xf5   : > { %1009 = vmatmul.bf16.vlgmr.msra.gmra.mxu2 %v2178_v13  ;;  %1038 = vmatmul.bf16.vlgmr.msra.gmra.mxu3 %v2178_v13  ;;  %v1554_v11 = vor.u32 %v1754_v4, %v1553_v3  ;;  %v1750_v24 = vld [vmem:[%s2650_s3 + $0xf4] sm:$0xf]  ;;  %v1555_v25 = vld [vmem:[%s2650_s3 + $0x114] sm:$0xf0]  ;;  %v1741_v26 = vld [vmem:[%s2650_s3 + $0xac] sm:$0xf]  ;;  %v1426_v44 = vor.u32 %v1720_v21, %v1423_v22 }
  0xf6   : > { %1117 = vmatpush.bf16.msrb.mxu2 %v1698_v14  ;;  %1146 = vmatpush.bf16.msrb.mxu3 %v1702_v15  ;;  %v1729_v14 = vld [vmem:[%s2650_s3 + $0x4c] sm:$0xf]  ;;  %v1510_v15 = vor.u32 %v1744_v8, %v1509_v7  ;;  %v1691_v30 = vld [vmem:[%s2650_s3 + $0x22c] sm:$0xf0]  ;;  %v1481_v36 = vld [vmem:[%s2650_s3 + $0x60] sm:$0xf] }
  0xf7   : > { %v1785_v28 = vld [vmem:[%s2650_s3 + $0x20c] sm:$0xf]  ;;  %v1519_v33 = vld [vmem:[%s2650_s3 + $0xcc] sm:$0xf0]  ;;  %v1705_v37 = vld [vmem:[%s2650_s3 + $0x218] sm:$0xf] }
  0xf8   : > { %973 = vmatpush.bf16.msrb.mxu1 %v1642_v16  ;;  %1060 = vmatpush.bf16.msrb.mxu0 %v1654_v18  ;;  %v1459_v16 = vld [vmem:[%s2650_s3 + $0x6c] sm:$0xf0]  ;;  %v1735_v18 = vld [vmem:[%s2650_s3 + $0x78] sm:$0xf0]  ;;  %v1736_v40 = vld [vmem:[%s2650_s3 + $0x80] sm:$0xf0]  ;;  %v1694_v48 = vor.u32 %v1785_v28, %v1691_v30 }
  0xf9   : > { %v1462_v27 = vor.u32 %v1729_v14, %v1459_v16  ;;  %v1474_v31 = vor.u32 %v1735_v18, %v1473_v17  ;;  %v1791_v38 = vld [vmem:[%s2650_s3 + $0x238] sm:$0xf0]  ;;  %v1482_v41 = vor.u32 %v1736_v40, %v1481_v36  ;;  %v1732_v42 = vld [vmem:[%s2650_s3 + $0x64] sm:$0xf]  ;;  %v1483_v43 = vld [vmem:[%s2650_s3 + $0x84] sm:$0xf0] }
  0xfa   : > { %1118 = vmatpush.bf16.msrb.mxu2 %v1662_v32  ;;  %1147 = vmatpush.bf16.msrb.mxu3 %v1666_v39  ;;  %v1558_v32 = vor.u32 %v1750_v24, %v1555_v25  ;;  %v1522_v39 = vor.u32 %v1741_v26, %v1519_v33  ;;  %v1445_v46 = vld [vmem:[%s2650_s3 + $0x18] sm:$0xf]  ;;  %v1727_v47 = vld [vmem:[%s2650_s3 + $0x38] sm:$0xf0]  ;;  %v1486_v50 = vor.u32 %v1732_v42, %v1483_v43  ;;  %v1669_v53 = vld [vmem:[%s2650_s3 + $0x1d0] sm:$0xf] }
  0xfb   : > { %v1782_v54 = vld [vmem:[%s2650_s3 + $0x1f0] sm:$0xf0]  ;;  %v1723_v55 = vld [vmem:[%s2650_s3 + $0x1c] sm:$0xf]  ;;  %v1447_v56 = vld [vmem:[%s2650_s3 + $0x3c] sm:$0xf0] }
  0xfc   : > { %974 = vmatpush.bf16.msrb.mxu1 %v1606_v34  ;;  %1061 = vmatpush.bf16.msrb.mxu0 %v1618_v35  ;;  %v1437_v34 = vld [vmem:[%s2650_s3 + $0x10] sm:$0xf]  ;;  %v1726_v35 = vld [vmem:[%s2650_s3 + $0x30] sm:$0xf0]  ;;  %v1670_v58 = vor.u32 %v1782_v54, %v1669_v53  ;;  %v1767_v59 = vld [vmem:[%s2650_s3 + $0x17c] sm:$0xf]  ;;  %v1450_v61 = vor.u32 %v1723_v55, %v1447_v56 }
  0xfd   : > { %v1438_v45 = vor.u32 %v1726_v35, %v1437_v34  ;;  %v1619_v60 = vld [vmem:[%s2650_s3 + $0x19c] sm:$0xf0]  ;;  %v1758_v1 = vld [vmem:[%s2650_s3 + $0x134] sm:$0xf]  ;;  %v1583_v3 = vld [vmem:[%s2650_s3 + $0x154] sm:$0xf0] }
  0xfe   : > { %1119 = vmatpush.bf16.msrb.mxu2 %v1626_v49  ;;  %1148 = vmatpush.bf16.msrb.mxu3 %v1630_v51  ;;  %v1706_v49 = vor.u32 %v1791_v38, %v1705_v37  ;;  %v1776_v51 = vld [vmem:[%s2650_s3 + $0x1c4] sm:$0xf]  ;;  %v1597_v4 = vld [vmem:[%s2650_s3 + $0x140] sm:$0xf]  ;;  %v1586_v7 = vor.u32 %v1758_v1, %v1583_v3  ;;  %v1511_v16 = vld [vmem:[%s2650_s3 + $0xc4] sm:$0xf0] }
  0xff   : > { %v1764_v6 = vld [vmem:[%s2650_s3 + $0x160] sm:$0xf0]  ;;  %v1731_v18 = vld [vmem:[%s2650_s3 + $0x5c] sm:$0xf]  ;;  %v1475_v19 = vld [vmem:[%s2650_s3 + $0x7c] sm:$0xf0] }
 0x100   : > { %975 = vmatpush.bf16.msrb.mxu1 %v1570_v52  ;;  %1062 = vmatpush.bf16.msrb.mxu0 %v1582_v29  ;;  %v1446_v52 = vor.u32 %v1727_v47, %v1445_v46  ;;  %v1655_v29 = vld [vmem:[%s2650_s3 + $0x1e4] sm:$0xf0]  ;;  %v1598_v8 = vor.u32 %v1764_v6, %v1597_v4  ;;  %v1561_v20 = vld [vmem:[%s2650_s3 + $0xf8] sm:$0xf]  ;;  %v1755_v21 = vld [vmem:[%s2650_s3 + $0x118] sm:$0xf0]  ;;  %v1478_v22 = vor.u32 %v1731_v18, %v1475_v19 }
 0x101   : > { %v1658_v57 = vor.u32 %v1776_v51, %v1655_v29  ;;  %v1525_v24 = vld [vmem:[%s2650_s3 + $0xb0] sm:$0xf]  ;;  %v1746_v25 = vld [vmem:[%s2650_s3 + $0xd0] sm:$0xf0]  ;;  %v1453_v34 = vld [vmem:[%s2650_s3 + $0x20] sm:$0xf] }
 0x102   : > { %1120 = vmatpush.bf16.msrb.mxu2 %v1590_v62  ;;  %1149 = vmatpush.bf16.msrb.mxu3 %v1594_v63  ;;  %v1633_v62 = vld [vmem:[%s2650_s3 + $0x188] sm:$0xf]  ;;  %v1773_v63 = vld [vmem:[%s2650_s3 + $0x1a8] sm:$0xf0]  ;;  %v1722_v26 = vld [vmem:[%s2650_s3 + $0x14] sm:$0xf]  ;;  %v1526_v28 = vor.u32 %v1746_v25, %v1525_v24 }
 0x103   : > { %966 = vmatmul.bf16.gmra.mxu1 %v2269_v5  ;;  %956 = vmatmul.bf16.gmra.mxu0 %v2280_v10  ;;  %v1728_v35 = vld [vmem:[%s2650_s3 + $0x40] sm:$0xf0] }
 0x104   : > { %976 = vmatpush.bf16.msrb.mxu1 %v1534_v0  ;;  %1063 = vmatpush.bf16.msrb.mxu0 %v1546_v2  ;;  %v1622_v0 = vor.u32 %v1767_v59, %v1619_v60  ;;  %v1634_v2 = vor.u32 %v1773_v63, %v1633_v62  ;;  %v1454_v36 = vor.u32 %v1728_v35, %v1453_v34 }
 0x105   : > { %1014 = vmatmul.bf16.gmra.mxu2 %v2280_v10  ;;  %1043 = vmatmul.bf16.gmra.mxu3 %v2280_v10 }
 0x106   : > { %1121 = vmatpush.bf16.msrb.mxu2 %v1554_v11  ;;  %1150 = vmatpush.bf16.msrb.mxu3 %v1558_v32  ;;  %v1749_v11 = vld [vmem:[%s2650_s3 + $0xec] sm:$0xf] }
 0x107   : > { %v1737_v32 = vld [vmem:[%s2650_s3 + $0x88] sm:$0xf0] }
 0x108   : > { %977 = vmatpush.bf16.msrb.mxu1 %v1498_v12  ;;  %1064 = vmatpush.bf16.msrb.mxu0 %v1510_v15  ;;  %v1547_v12 = vld [vmem:[%s2650_s3 + $0x10c] sm:$0xf0]  ;;  %v1740_v15 = vld [vmem:[%s2650_s3 + $0xa4] sm:$0xf] }
 0x109   : > { %v1550_v14 = vor.u32 %v1749_v11, %v1547_v12  ;;  %v1514_v17 = vor.u32 %v1740_v15, %v1511_v16 }
 0x10a   : > { %1122 = vmatpush.bf16.msrb.mxu2 %v1518_v23  ;;  %1151 = vmatpush.bf16.msrb.mxu3 %v1522_v39  ;;  %v1562_v23 = vor.u32 %v1755_v21, %v1561_v20 }
 0x10c   : > { %978 = vmatpush.bf16.msrb.mxu1 %v1462_v27  ;;  %1065 = vmatpush.bf16.msrb.mxu0 %v1474_v31  ;;  %v1439_v27 = vld [vmem:[%s2650_s3 + $0x34] sm:$0xf0]  ;;  %v1489_v31 = vld [vmem:[%s2650_s3 + $0x68] sm:$0xf] }
 0x10d   : > { %v1442_v30 = vor.u32 %v1722_v26, %v1439_v27  ;;  %v1490_v33 = vor.u32 %v1737_v32, %v1489_v31 }
 0x10e   : > { %1123 = vmatpush.bf16.msrb.mxu2 %v1482_v41  ;;  %1152 = vmatpush.bf16.msrb.mxu3 %v1486_v50 }
 0x110   : > { %979 = vmatpush.bf16.msrb.mxu1 %v1426_v44  ;;  %1066 = vmatpush.bf16.msrb.mxu0 %v1438_v45 }
 0x112   : > { %1124 = vmatpush.bf16.msrb.mxu2 %v1446_v52  ;;  %1153 = vmatpush.bf16.msrb.mxu3 %v1450_v61 }
 0x113   : > { %980 = vmatmul.bf16.vlgmr.msrb.gmra.mxu1 %v2178_v13  ;;  %1067 = vmatmul.bf16.vlgmr.msrb.gmra.mxu0 %v2178_v13 }
 0x114   : > { %1088 = vmatpush.bf16.msra.mxu1 %v1694_v48  ;;  %1175 = vmatpush.bf16.msra.mxu0 %v1706_v49 }
 0x115   : > { %1019 = vmatmul.bf16.gmra.mxu2 %v2167_v9  ;;  %1048 = vmatmul.bf16.gmra.mxu3 %v2167_v9 }
 0x116   : > { %1812 = vmatpush.bf16.msra.mxu2 %v1706_v49 }
 0x118   : > { %1089 = vmatpush.bf16.msra.mxu1 %v1658_v57  ;;  %1176 = vmatpush.bf16.msra.mxu0 %v1670_v58 }
 0x11a   : > { %1813 = vmatpush.bf16.msra.mxu2 %v1670_v58 }
 0x11c   : > { %1090 = vmatpush.bf16.msra.mxu1 %v1622_v0  ;;  %1177 = vmatpush.bf16.msra.mxu0 %v1634_v2 }
 0x11e   : > { %1814 = vmatpush.bf16.msra.mxu2 %v1634_v2 }
 0x120   : > { %1091 = vmatpush.bf16.msra.mxu1 %v1586_v7  ;;  %1178 = vmatpush.bf16.msra.mxu0 %v1598_v8 }
 0x122   : > { %1815 = vmatpush.bf16.msra.mxu2 %v1598_v8 }
 0x123   : > { %985 = vmatmul.bf16.gmra.mxu1 %v2280_v10  ;;  %1072 = vmatmul.bf16.gmra.mxu0 %v2280_v10 }
 0x124   : > { %1092 = vmatpush.bf16.msra.mxu1 %v1550_v14  ;;  %1179 = vmatpush.bf16.msra.mxu0 %v1562_v23 }
 0x125   : > { %1024 = vmatmul.bf16.gmra.mxu2 %v2269_v5  ;;  %1053 = vmatmul.bf16.gmra.mxu3 %v2269_v5 }
 0x126   : > { %1816 = vmatpush.bf16.msra.mxu2 %v1562_v23 }
 0x128   : > { %1093 = vmatpush.bf16.msra.mxu1 %v1514_v17  ;;  %1180 = vmatpush.bf16.msra.mxu0 %v1526_v28 }
 0x12a   : > { %1817 = vmatpush.bf16.msra.mxu2 %v1526_v28 }
 0x12c   : > { %1094 = vmatpush.bf16.msra.mxu1 %v1478_v22  ;;  %1181 = vmatpush.bf16.msra.mxu0 %v1490_v33 }
 0x12e   : > { %1818 = vmatpush.bf16.msra.mxu2 %v1490_v33 }
 0x130   : > { %1095 = vmatpush.bf16.msra.mxu1 %v1442_v30  ;;  %1182 = vmatpush.bf16.msra.mxu0 %v1454_v36 }
 0x132   : > { %1819 = vmatpush.bf16.msra.mxu2 %v1454_v36 }
 0x133   : > { %990 = vmatmul.bf16.gmra.mxu1 %v2167_v9  ;;  %1077 = vmatmul.bf16.gmra.mxu0 %v2167_v9 }
 0x135   : > { %1125 = vmatmul.bf16.vlgmr.msrb.gmra.mxu2 %v2178_v13  ;;  %1154 = vmatmul.bf16.vlgmr.msrb.gmra.mxu3 %v2178_v13 }
 0x143   : > { %995 = vmatmul.bf16.gmra.mxu1 %v2269_v5  ;;  %1082 = vmatmul.bf16.gmra.mxu0 %v2269_v5 }
 0x145   : > { %1130 = vmatmul.bf16.gmra.mxu2 %v2280_v10  ;;  %1159 = vmatmul.bf16.gmra.mxu3 %v2280_v10 }
 0x153   : > { %1096 = vmatmul.bf16.vlgmr.msra.gmra.mxu1 %v2178_v13  ;;  %1183 = vmatmul.bf16.vlgmr.msra.gmra.mxu0 %v2178_v13 }
 0x155   : > { %1135 = vmatmul.bf16.gmra.mxu2 %v2167_v9  ;;  %1164 = vmatmul.bf16.gmra.mxu3 %v2167_v9 }
 0x163   : > { %1101 = vmatmul.bf16.gmra.mxu1 %v2280_v10  ;;  %1188 = vmatmul.bf16.gmra.mxu0 %v2280_v10 }
 0x165   : > { %1140 = vmatmul.bf16.gmra.mxu2 %v2269_v5  ;;  %1169 = vmatmul.bf16.gmra.mxu3 %v2269_v5 }
 0x170   : > { %v2472_v37 = vpop.f32.mrf.mxu1  ;;  %v952_v38 = vpop.f32.mrf.mxu0 }
 0x173   : > { %1106 = vmatmul.bf16.gmra.mxu1 %v2167_v9  ;;  %1193 = vmatmul.bf16.gmra.mxu0 %v2167_v9 }
 0x175   : > { %1198 = vmatmul.bf16.vlgmr.msra.gmra.mxu2 %v2269_v5 }
 0x178   : > { %v1010_v13 = vpop.f32.mrf.mxu2  ;;  %v1039_v39 = vpop.f32.mrf.mxu3 }
 0x179   : > { %v2477_v40 = vpop.f32.mrf.mxu1  ;;  %v1205_v41 = vpack.c.bf16 %v1039_v39, %v1010_v13  ;;  %v954_v42 = vpop.f32.mrf.mxu0 }
 0x17b   : > { %1245 = vst [vmem:[%s2651_s4 + $0x8] sm:$0xff] %v1205_v41 }
 0x180   : > { %v1012_v10 = vpop.f32.mrf.mxu2  ;;  %v1041_v43 = vpop.f32.mrf.mxu3 }
 0x181   : > { %v2482_v44 = vpop.f32.mrf.mxu1  ;;  %v1210_v45 = vpack.c.bf16 %v1041_v43, %v1012_v10  ;;  %v957_v46 = vpop.f32.mrf.mxu0 }
 0x183   : > { %1250 = vst [vmem:[%s2651_s4 + $0x2c] sm:$0xff] %v1210_v45  ;;  %1111 = vmatmul.bf16.gmra.mxu1 %v2269_v5 }
 0x188   : > { %v1015_v9 = vpop.f32.mrf.mxu2  ;;  %v1044_v47 = vpop.f32.mrf.mxu3 }
 0x189   : > { %v2488_v48 = vpop.f32.mrf.mxu1  ;;  %v1215_v49 = vpack.c.bf16 %v1044_v47, %v1015_v9  ;;  %v959_v50 = vpop.f32.mrf.mxu0 }
 0x18b   : > { %1255 = vst [vmem:[%s2651_s4 + $0x50] sm:$0xff] %v1215_v49 }
 0x190   : > { %v1017_v51 = vpop.f32.mrf.mxu2  ;;  %v1046_v52 = vpop.f32.mrf.mxu3 }
 0x191   : > { %v981_v29 = vpop.f32.mrf.mxu1  ;;  %v1220_v53 = vpack.c.bf16 %v1046_v52, %v1017_v51  ;;  %v2493_v54 = vpop.f32.mrf.mxu0 }
 0x192   : > { %v1204_v55 = vpack.c.bf16 %v981_v29, %v952_v38 }
 0x193   : > { %1260 = vst [vmem:[%s2651_s4 + $0x74] sm:$0xff] %v1220_v53 }
 0x194   : > { %1244 = vst [vmem:[%s2651_s4] sm:$0xff] %v1204_v55 }
 0x198   : > { %v1020_v5 = vpop.f32.mrf.mxu2  ;;  %v1049_v56 = vpop.f32.mrf.mxu3 }
 0x199   : > { %v983_v57 = vpop.f32.mrf.mxu1  ;;  %v1225_v58 = vpack.c.bf16 %v1049_v56, %v1020_v5  ;;  %v2501_v59 = vpop.f32.mrf.mxu0 }
 0x19a   : > { %v1209_v60 = vpack.c.bf16 %v983_v57, %v954_v42 }
 0x19b   : > { %1265 = vst [vmem:[%s2651_s4 + $0x98] sm:$0xff] %v1225_v58 }
 0x19c   : > { %1249 = vst [vmem:[%s2651_s4 + $0x24] sm:$0xff] %v1209_v60 }
 0x1a0   : > { %v1022_v61 = vpop.f32.mrf.mxu2  ;;  %v1051_v62 = vpop.f32.mrf.mxu3 }
 0x1a1   : > { %v986_v63 = vpop.f32.mrf.mxu1  ;;  %v1230_v0 = vpack.c.bf16 %v1051_v62, %v1022_v61  ;;  %v2509_v1 = vpop.f32.mrf.mxu0 }
 0x1a2   : > { %v1214_v2 = vpack.c.bf16 %v986_v63, %v957_v46 }
 0x1a3   : > { %1270 = vst [vmem:[%s2651_s4 + $0xbc] sm:$0xff] %v1230_v0 }
 0x1a4   : > { %1254 = vst [vmem:[%s2651_s4 + $0x48] sm:$0xff] %v1214_v2 }
 0x1a8   : > { %v1025_v3 = vpop.f32.mrf.mxu2  ;;  %v1054_v4 = vpop.f32.mrf.mxu3 }
 0x1a9   : > { %v988_v6 = vpop.f32.mrf.mxu1  ;;  %v1235_v7 = vpack.c.bf16 %v1054_v4, %v1025_v3  ;;  %v2517_v8 = vpop.f32.mrf.mxu0 }
 0x1aa   : > { %v1219_v11 = vpack.c.bf16 %v988_v6, %v959_v50 }
 0x1ab   : > { %1275 = vst [vmem:[%s2651_s4 + $0xe0] sm:$0xff] %v1235_v7 }
 0x1ac   : > { %1259 = vst [vmem:[%s2651_s4 + $0x6c] sm:$0xff] %v1219_v11 }
 0x1b0   : > { %v1027_v12 = vpop.f32.mrf.mxu2  ;;  %v1056_v14 = vpop.f32.mrf.mxu3 }
 0x1b1   : > { %v991_v15 = vpop.f32.mrf.mxu1  ;;  %v1240_v16 = vpack.c.bf16 %v1056_v14, %v1027_v12  ;;  %v2525_v17 = vpop.f32.mrf.mxu0 }
 0x1b2   : > { %v1224_v18 = vpack.c.bf16 %v991_v15, %v2472_v37 }
 0x1b3   : > { %1280 = vst [vmem:[%s2651_s4 + $0x104] sm:$0xff] %v1240_v16 }
 0x1b4   : > { %1264 = vst [vmem:[%s2651_s4 + $0x90] sm:$0xff] %v1224_v18 }
 0x1b8   : > { %v1126_v19 = vpop.f32.mrf.mxu2  ;;  %v1155_v20 = vpop.f32.mrf.mxu3 }
 0x1b9   : > { %v993_v21 = vpop.f32.mrf.mxu1  ;;  %v1207_v22 = vpack.c.bf16 %v1155_v20, %v1126_v19  ;;  %v2534_v23 = vpop.f32.mrf.mxu0 }
 0x1ba   : > { %v1229_v24 = vpack.c.bf16 %v993_v21, %v2477_v40 }
 0x1bb   : > { %1247 = vst [vmem:[%s2651_s4 + $0x18] sm:$0xff] %v1207_v22 }
 0x1bc   : > { %1269 = vst [vmem:[%s2651_s4 + $0xb4] sm:$0xff] %v1229_v24 }
 0x1c0   : > { %v1128_v25 = vpop.f32.mrf.mxu2  ;;  %v1157_v26 = vpop.f32.mrf.mxu3 }
 0x1c1   : > { %v996_v27 = vpop.f32.mrf.mxu1  ;;  %v1212_v28 = vpack.c.bf16 %v1157_v26, %v1128_v25  ;;  %v2543_v30 = vpop.f32.mrf.mxu0 }
 0x1c2   : > { %v1234_v31 = vpack.c.bf16 %v996_v27, %v2482_v44 }
 0x1c3   : > { %1252 = vst [vmem:[%s2651_s4 + $0x3c] sm:$0xff] %v1212_v28 }
 0x1c4   : > { %1274 = vst [vmem:[%s2651_s4 + $0xd8] sm:$0xff] %v1234_v31 }
 0x1c8   : > { %v1131_v32 = vpop.f32.mrf.mxu2  ;;  %v1160_v33 = vpop.f32.mrf.mxu3 }
 0x1c9   : > { %v998_v34 = vpop.f32.mrf.mxu1  ;;  %v1217_v35 = vpack.c.bf16 %v1160_v33, %v1131_v32  ;;  %v2552_v36 = vpop.f32.mrf.mxu0 }
 0x1ca   : > { %v1239_v37 = vpack.c.bf16 %v998_v34, %v2488_v48 }
 0x1cb   : > { %1257 = vst [vmem:[%s2651_s4 + $0x60] sm:$0xff] %v1217_v35 }
 0x1cc   : > { %1279 = vst [vmem:[%s2651_s4 + $0xfc] sm:$0xff] %v1239_v37 }
 0x1d0   : > { %v1133_v38 = vpop.f32.mrf.mxu2  ;;  %v1162_v13 = vpop.f32.mrf.mxu3 }
 0x1d1   : > { %v1097_v39 = vpop.f32.mrf.mxu1  ;;  %v1222_v40 = vpack.c.bf16 %v1162_v13, %v1133_v38  ;;  %v1184_v41 = vpop.f32.mrf.mxu0 }
 0x1d2   : > { %v1206_v42 = vpack.c.bf16 %v1097_v39, %v2493_v54  ;;  %v1208_v10 = vpack.c.bf16 %v1184_v41, %v1184_v41 }
 0x1d3   : > { %1262 = vst [vmem:[%s2651_s4 + $0x84] sm:$0xff] %v1222_v40 }
 0x1d4   : > { %1246 = vst [vmem:[%s2651_s4 + $0x10] sm:$0xff] %v1206_v42 }
 0x1d5   : > { %1248 = vst [vmem:[%s2651_s4 + $0x20] sm:$0xf] %v1208_v10 }
 0x1d8   : > { %v1136_v43 = vpop.f32.mrf.mxu2  ;;  %v1165_v44 = vpop.f32.mrf.mxu3 }
 0x1d9   : > { %v1099_v45 = vpop.f32.mrf.mxu1  ;;  %v1227_v46 = vpack.c.bf16 %v1165_v44, %v1136_v43  ;;  %v1186_v9 = vpop.f32.mrf.mxu0 }
 0x1da   : > { %v1211_v47 = vpack.c.bf16 %v1099_v45, %v2501_v59  ;;  %v1213_v48 = vpack.c.bf16 %v1186_v9, %v1186_v9 }
 0x1db   : > { %1267 = vst [vmem:[%s2651_s4 + $0xa8] sm:$0xff] %v1227_v46 }
 0x1dc   : > { %1251 = vst [vmem:[%s2651_s4 + $0x34] sm:$0xff] %v1211_v47 }
 0x1dd   : > { %1253 = vst [vmem:[%s2651_s4 + $0x44] sm:$0xf] %v1213_v48 }
 0x1e0   : > { %v1138_v49 = vpop.f32.mrf.mxu2  ;;  %v1167_v50 = vpop.f32.mrf.mxu3 }
 0x1e1   : > { %v1102_v51 = vpop.f32.mrf.mxu1  ;;  %v1232_v52 = vpack.c.bf16 %v1167_v50, %v1138_v49  ;;  %v1189_v29 = vpop.f32.mrf.mxu0 }
 0x1e2   : > { %v1216_v53 = vpack.c.bf16 %v1102_v51, %v2509_v1  ;;  %v1218_v54 = vpack.c.bf16 %v1189_v29, %v1189_v29 }
 0x1e3   : > { %1272 = vst [vmem:[%s2651_s4 + $0xcc] sm:$0xff] %v1232_v52 }
 0x1e4   : > { %1256 = vst [vmem:[%s2651_s4 + $0x58] sm:$0xff] %v1216_v53 }
 0x1e5   : > { %1258 = vst [vmem:[%s2651_s4 + $0x68] sm:$0xf] %v1218_v54 }
 0x1e8   : > { %v1141_v55 = vpop.f32.mrf.mxu2  ;;  %v1170_v5 = vpop.f32.mrf.mxu3 }
 0x1e9   : > { %v1104_v56 = vpop.f32.mrf.mxu1  ;;  %v1237_v57 = vpack.c.bf16 %v1170_v5, %v1141_v55  ;;  %v1191_v58 = vpop.f32.mrf.mxu0 }
 0x1ea   : > { %v1221_v59 = vpack.c.bf16 %v1104_v56, %v2517_v8  ;;  %v1223_v60 = vpack.c.bf16 %v1191_v58, %v1191_v58 }
 0x1eb   : > { %1277 = vst [vmem:[%s2651_s4 + $0xf0] sm:$0xff] %v1237_v57 }
 0x1ec   : > { %1261 = vst [vmem:[%s2651_s4 + $0x7c] sm:$0xff] %v1221_v59 }
 0x1ed   : > { %1263 = vst [vmem:[%s2651_s4 + $0x8c] sm:$0xf] %v1223_v60 }
 0x1f0   : > { %v1143_v61 = vpop.f32.mrf.mxu2  ;;  %v1172_v62 = vpop.f32.mrf.mxu3 }
 0x1f1   : > { %v1107_v63 = vpop.f32.mrf.mxu1  ;;  %v1242_v0 = vpack.c.bf16 %v1172_v62, %v1143_v61  ;;  %v1194_v1 = vpop.f32.mrf.mxu0 }
 0x1f2   : > { %v1226_v2 = vpack.c.bf16 %v1107_v63, %v2525_v17  ;;  %v1228_v3 = vpack.c.bf16 %v1194_v1, %v1194_v1 }
 0x1f3   : > { %1282 = vst [vmem:[%s2651_s4 + $0x114] sm:$0xff] %v1242_v0 }
 0x1f4   : > { %1266 = vst [vmem:[%s2651_s4 + $0xa0] sm:$0xff] %v1226_v2 }
 0x1f5   : > { %1268 = vst [vmem:[%s2651_s4 + $0xb0] sm:$0xf] %v1228_v3 }
 0x1f8   : > { %v1199_v4 = vpop.f32.mrf.mxu2 }
 0x1f9   : > { %v1109_v6 = vpop.f32.mrf.mxu1  ;;  %v1238_v7 = vpack.c.bf16 %v1199_v4, %v1199_v4  ;;  %v1196_v8 = vpop.f32.mrf.mxu0 }
 0x1fa   : > { %v1231_v11 = vpack.c.bf16 %v1109_v6, %v2534_v23  ;;  %v1233_v12 = vpack.c.bf16 %v1196_v8, %v1196_v8 }
 0x1fb   : > { %1278 = vst [vmem:[%s2651_s4 + $0xf8] sm:$0xf] %v1238_v7 }
 0x1fc   : > { %1271 = vst [vmem:[%s2651_s4 + $0xc4] sm:$0xff] %v1231_v11 }
 0x1fd   : > { %1273 = vst [vmem:[%s2651_s4 + $0xd4] sm:$0xf] %v1233_v12 }
 0x200   : > { %v1201_v14 = vpop.f32.mrf.mxu2 }
 0x201   : > { %v1112_v15 = vpop.f32.mrf.mxu1  ;;  %v1243_v16 = vpack.c.bf16 %v1201_v14, %v1201_v14 }
 0x202   : > { %v1236_v17 = vpack.c.bf16 %v1112_v15, %v2543_v30 }
 0x203   : > { %1283 = vst [vmem:[%s2651_s4 + $0x11c] sm:$0xf] %v1243_v16 }
 0x204   : > { %1276 = vst [vmem:[%s2651_s4 + $0xe8] sm:$0xff] %v1236_v17 }
 0x209   : > { %v1114_v18 = vpop.f32.mrf.mxu1 }
 0x20a   : > { %v1241_v19 = vpack.c.bf16 %v1114_v18, %v2552_v36 }
 0x20c   : > { %1281 = vst [vmem:[%s2651_s4 + $0x10c] sm:$0xff] %v1241_v19 }
 0x20d PF: > { %s14_s19 = sadd.s32 1, %s1900_s19   ;;  %s2652_s15 = smov %s1888_s16 }
 0x20e   : > { %p11_p12 = scmp.ge.s32.totalorder %s14_s19, 11   ;;  %s2653_s16 = smov %s1963_s23 }
 0x20f   : > { %s2654_s17 = smov %s1896_s18  ;;  %s2655_s18 = smov %s2657_s20 }
 0x210   :  { %13 = sbr.rel (!%p11_p12) target bundleno = 3 (0x3), region = 123 }

</bundles_post_ra>
